<compile_context>
chip_gen: v7x
topology: tpu7x:2x2x1
jax: 0.10.0
libtpu: 0.0.40
codegen_flags: <defaults>
</compile_context>

<pallas_src>
import functools
import math

import jax
import jax.numpy as jnp
from jax.experimental import pallas as pl
from jax.experimental.pallas import tpu as pltpu

LN_EPS = 1e-5       # nn.LayerNorm default
NEG_INF = -1e6      # d2l masked_softmax fill value


def _layer_norm(x, gamma, beta):
    mean = jnp.mean(x, axis=-1, keepdims=True)
    centered = x - mean
    var = jnp.mean(centered * centered, axis=-1, keepdims=True)
    return centered * jax.lax.rsqrt(var + LN_EPS) * gamma + beta


@functools.lru_cache(maxsize=None)
def _vmem_limit_bytes():
    # Generation-conditional VMEM budget: 3/4 of physical VMEM
    # (v5e/v6e: 128 MiB -> 96 MiB, v7x: 64 MiB -> 48 MiB). Conservative fallback.
    try:
        cap = int(pltpu.get_tpu_info().vmem_capacity_bytes)
        return max(32 * 1024 * 1024, (cap * 3) // 4)
    except Exception:
        return 48 * 1024 * 1024


def _q_tile_size(S):
    # Prefer >=2 query tiles (pipeline depth + v7x megacore balance); tile must
    # be a multiple of 8 sublanes and divide S. Fall back to the full sequence.
    for t in (256, 128, 64, 32, 16, 8):
        if t < S and S % t == 0:
            return t
    return S


# ----------------------------------------------------------------------------
# One fused transformer encoder block (per (batch, query-tile) grid step)
# ----------------------------------------------------------------------------
def encoder_block_kernel(valid_ref,                 # SMEM scalar prefetch (B,) int32
                         x_ref,                     # (1, S, H)   f32
                         wqkv_ref,                  # (H, 3H)     bf16
                         bqkv_ref,                  # (1, 3H)     f32
                         wo_ref,                    # (H, H)      bf16
                         wf1_ref,                   # (H, F)      bf16
                         bf1_ref,                   # (1, F)      f32
                         wf2_ref,                   # (F, H)      bf16
                         vec_ref,                   # (6, H)      f32  [bo,g1,b1,bf2,g2,b2]
                         o_ref,                     # (1, Sq, H)  f32
                         attn_scratch,              # (Sq, H)     f32
                         *, num_heads):
    b = pl.program_id(0)
    qt = pl.program_id(1)
    S, H = x_ref.shape[1], x_ref.shape[2]
    Sq = o_ref.shape[1]
    dh = H // num_heads
    scale = 1.0 / math.sqrt(dh)

    x_full = x_ref[0]                                        # (S, H) f32
    qs = pl.multiple_of(qt * Sq, Sq)
    x_tile = x_ref[0, pl.ds(qs, Sq), :]                      # (Sq, H) f32

    xb_full = x_full.astype(jnp.bfloat16)
    xb_tile = x_tile.astype(jnp.bfloat16)

    wqkv = wqkv_ref[...]                                     # (H, 3H) bf16
    bqkv = bqkv_ref[...]                                     # (1, 3H) f32

    # Fused K/V projection over the full sequence (one MXU pass, N = 2H) plus a
    # Q projection restricted to this query tile. bf16 operands, f32 accumulate.
    kv = jnp.dot(xb_full, wqkv[:, H:],
                 preferred_element_type=jnp.float32) + bqkv[:, H:]   # (S, 2H)
    k = kv[:, :H]
    v = kv[:, H:]
    q = jnp.dot(xb_tile, wqkv[:, :H],
                preferred_element_type=jnp.float32) + bqkv[:, :H]    # (Sq, H)

    # Key-validity mask from scalar-prefetched valid_lens: (1, S) lane iota,
    # broadcast against the f32 scores (no (S, S) int32 temporary).
    key_ids = jax.lax.broadcasted_iota(jnp.int32, (1, S), 1)
    mask = key_ids < valid_ref[b]                            # (1, S) bool

    # Per-head scaled-dot-product attention; each head writes its slice of the
    # VMEM scratch directly (no concatenate -> bounded live ranges).
    for h in range(num_heads):
        lo = h * dh
        qh = q[:, lo:lo + dh].astype(jnp.bfloat16)           # (Sq, dh)
        kh = k[:, lo:lo + dh].astype(jnp.bfloat16)           # (S, dh)
        vh = v[:, lo:lo + dh].astype(jnp.bfloat16)           # (S, dh)
        scores = jax.lax.dot_general(
            qh, kh, (((1,), (1,)), ((), ())),
            preferred_element_type=jnp.float32) * scale      # (Sq, S) f32
        scores = jnp.where(mask, scores, NEG_INF)            # mask fill in f32
        m = jnp.max(scores, axis=-1, keepdims=True)
        e = jnp.exp(scores - m)
        inv = pl.reciprocal(jnp.sum(e, axis=-1, keepdims=True), approx=True)
        p = (e * inv).astype(jnp.bfloat16)
        attn_scratch[:, lo:lo + dh] = jnp.dot(
            p, vh, preferred_element_type=jnp.float32)

    vec = vec_ref[...]                                       # (6, H) f32
    bo, gamma1, beta1 = vec[0:1], vec[1:2], vec[2:3]
    bf2, gamma2, beta2 = vec[3:4], vec[4:5], vec[5:6]

    # Output projection W_o.
    attn = jnp.dot(attn_scratch[...].astype(jnp.bfloat16), wo_ref[...],
                   preferred_element_type=jnp.float32) + bo

    # AddNorm 1 (dropout == identity at inference).
    y = _layer_norm(x_tile + attn, gamma1, beta1)

    # Position-wise FFN.
    hdn = jnp.dot(y.astype(jnp.bfloat16), wf1_ref[...],
                  preferred_element_type=jnp.float32) + bf1_ref[...]
    hdn = jnp.maximum(hdn, 0.0)
    f = jnp.dot(hdn.astype(jnp.bfloat16), wf2_ref[...],
                preferred_element_type=jnp.float32) + bf2

    # AddNorm 2.
    o_ref[0] = _layer_norm(y + f, gamma2, beta2).astype(o_ref.dtype)


def encoder_block(X, valid_lens, lp, *, num_heads, q_tile=None):
    B, S, H = X.shape
    F = lp["w_ffn1"].shape[1]
    assert H % num_heads == 0, "num_hiddens must be divisible by num_heads"
    Sq = q_tile if q_tile is not None else _q_tile_size(S)
    assert S % Sq == 0

    x_map = lambda b, qt, vl: (b, 0, 0)      # full sequence (K/V + tile residual)
    o_map = lambda b, qt, vl: (b, qt, 0)     # lane-dense query-tile output
    w_map = lambda b, qt, vl: (0, 0)         # weights resident across grid steps

    kernel = functools.partial(encoder_block_kernel, num_heads=num_heads)
    grid_spec = pltpu.PrefetchScalarGridSpec(
        num_scalar_prefetch=1,                       # valid_lens -> SMEM
        grid=(B, S // Sq),
        in_specs=[
            pl.BlockSpec((1, S, H), x_map),          # X (full seq, per batch)
            pl.BlockSpec((H, 3 * H), w_map),         # W_qkv  (bf16)
            pl.BlockSpec((1, 3 * H), w_map),         # b_qkv  (f32)
            pl.BlockSpec((H, H), w_map),             # W_o    (bf16)
            pl.BlockSpec((H, F), w_map),             # W_ffn1 (bf16)
            pl.BlockSpec((1, F), w_map),             # b_ffn1 (f32)
            pl.BlockSpec((F, H), w_map),             # W_ffn2 (bf16)
            pl.BlockSpec((6, H), w_map),             # packed bo/g1/b1/bf2/g2/b2
        ],
        out_specs=pl.BlockSpec((1, Sq, H), o_map),
        scratch_shapes=[pltpu.VMEM((Sq, H), jnp.float32)],   # attn head outputs
    )
    return pl.pallas_call(
        kernel,
        out_shape=jax.ShapeDtypeStruct((B, S, H), X.dtype),
        grid_spec=grid_spec,
        compiler_params=pltpu.CompilerParams(
            dimension_semantics=("parallel", "parallel"),
            vmem_limit_bytes=_vmem_limit_bytes(),
        ),
    )(valid_lens, X,
      lp["w_qkv"], lp["b_qkv"], lp["w_o"],
      lp["w_ffn1"], lp["b_ffn1"], lp["w_ffn2"], lp["vecs"])


# ----------------------------------------------------------------------------
# Full BertEncoder forward
# ----------------------------------------------------------------------------
def bert_encoder_forward(tokens, segments, valid_lens, weights, *, num_heads):
    B, S = tokens.shape
    # Embedding gathers + 3-way add left to XLA (fuses into the gather output
    # under jit), so X makes a single HBM write before layer 0.
    X = (jnp.take(weights["token_embedding"], tokens, axis=0)
         + jnp.take(weights["segment_embedding"], segments, axis=0)
         + weights["pos_embedding"][:, :S, :])
    if valid_lens is None:
        valid_lens = jnp.full((B,), S, dtype=jnp.int32)
    valid_lens = valid_lens.astype(jnp.int32)
    for lp in weights["layers"]:
        X = encoder_block(X, valid_lens, lp, num_heads=num_heads)
    return X


# ----------------------------------------------------------------------------
# Parameters & pure-JAX reference
# ----------------------------------------------------------------------------
def init_params(key, *, vocab_size, num_hiddens, ffn_num_hiddens, num_heads,
                num_layers, max_len):
    del num_heads  # layout does not depend on it
    keys = jax.random.split(key, 3 + num_layers)
    H, F = num_hiddens, ffn_num_hiddens
    tok = jax.random.normal(keys[0], (vocab_size, H), jnp.float32) * 0.02
    seg = jax.random.normal(keys[1], (2, H), jnp.float32) * 0.02
    pos = jax.random.normal(keys[2], (1, max_len, H), jnp.float32) * 0.02

    def lin(k, fan_in, fan_out):
        kw, kb = jax.random.split(k)
        w = jax.random.normal(kw, (fan_in, fan_out), jnp.float32) * 0.02
        b = jax.random.normal(kb, (1, fan_out), jnp.float32) * 0.02
        return w, b

    layers = []
    for i in range(num_layers):
        lk = jax.random.split(keys[3 + i], 6)
        wq, bq = lin(lk[0], H, H)
        wk, bk = lin(lk[1], H, H)
        wv, bv = lin(lk[2], H, H)
        wo, bo = lin(lk[3], H, H)
        wf1, bf1 = lin(lk[4], H, F)
        wf2, bf2 = lin(lk[5], F, H)
        ones = jnp.ones((1, H), jnp.float32)
        zeros = jnp.zeros((1, H), jnp.float32)
        layers.append(dict(
            # Weights pre-transposed to (in, out) and stored bf16 (MXU native;
            # halves HBM weight traffic and VMEM residency).
            w_qkv=jnp.concatenate([wq, wk, wv], axis=1).astype(jnp.bfloat16),
            b_qkv=jnp.concatenate([bq, bk, bv], axis=1),
            w_o=wo.astype(jnp.bfloat16),
            w_ffn1=wf1.astype(jnp.bfloat16),
            b_ffn1=bf1,
            w_ffn2=wf2.astype(jnp.bfloat16),
            # [b_o, gamma1, beta1, b_ffn2, gamma2, beta2] packed -> one DMA.
            vecs=jnp.concatenate([bo, ones, zeros, bf2, ones, zeros], axis=0),
        ))
    return dict(token_embedding=tok, segment_embedding=seg, pos_embedding=pos,
                layers=layers)


def reference_forward(tokens, segments, valid_lens, weights, *, num_heads):
    B, S = tokens.shape
    nh = num_heads
    X = (weights["token_embedding"][tokens] + weights["segment_embedding"][segments]
         + weights["pos_embedding"][:, :S, :])
    if valid_lens is None:
        valid_lens = jnp.full((B,), S, jnp.int32)
    hp = jax.lax.Precision.HIGHEST
    for lp in weights["layers"]:
        H = X.shape[-1]
        dh = H // nh
        wqkv = lp["w_qkv"].astype(jnp.float32)
        wq, wk, wv = wqkv[:, :H], wqkv[:, H:2 * H], wqkv[:, 2 * H:]
        bqkv = lp["b_qkv"]
        bq, bk, bv = bqkv[:, :H], bqkv[:, H:2 * H], bqkv[:, 2 * H:]
        wo = lp["w_o"].astype(jnp.float32)
        wf1 = lp["w_ffn1"].astype(jnp.float32)
        wf2 = lp["w_ffn2"].astype(jnp.float32)
        vec = lp["vecs"]
        bo, gamma1, beta1 = vec[0:1], vec[1:2], vec[2:3]
        bf2, gamma2, beta2 = vec[3:4], vec[4:5], vec[5:6]

        def split(t):
            return t.reshape(B, S, nh, dh).transpose(0, 2, 1, 3)

        q = split(jnp.einsum("bsh,hd->bsd", X, wq, precision=hp) + bq)
        k = split(jnp.einsum("bsh,hd->bsd", X, wk, precision=hp) + bk)
        v = split(jnp.einsum("bsh,hd->bsd", X, wv, precision=hp) + bv)
        scores = jnp.einsum("bhqd,bhkd->bhqk", q, k, precision=hp) / math.sqrt(dh)
        key_ids = jnp.arange(S)[None, None, None, :]
        mask = key_ids < valid_lens[:, None, None, None]
        scores = jnp.where(mask, scores, NEG_INF)
        p = jax.nn.softmax(scores, axis=-1)
        attn = jnp.einsum("bhqk,bhkd->bhqd", p, v, precision=hp)
        attn = attn.transpose(0, 2, 1, 3).reshape(B, S, H)
        attn = jnp.einsum("bsh,hd->bsd", attn, wo, precision=hp) + bo
        Y = _layer_norm(X + attn, gamma1, beta1)
        hdn = jnp.maximum(
            jnp.einsum("bsh,hf->bsf", Y, wf1, precision=hp) + lp["b_ffn1"], 0.0)
        f = jnp.einsum("bsf,fh->bsh", hdn, wf2, precision=hp) + bf2
        X = _layer_norm(Y + f, gamma2, beta2)
    return X


if __name__ == "__main__":
    batch_size = 2
    seq_len = 16
    num_hiddens = 32
    ffn_num_hiddens = 64
    num_heads = 2
    num_layers = 2
    vocab_size = 128
    max_len = 32

    key = jax.random.PRNGKey(0)
    kt, ks, kv, kp = jax.random.split(key, 4)
    tokens = jax.random.randint(kt, (batch_size, seq_len), 0, vocab_size,
                                dtype=jnp.int32)
    segments = jax.random.randint(ks, (batch_size, seq_len), 0, 2, dtype=jnp.int32)
    valid_lens = jax.random.randint(kv, (batch_size,), 1, seq_len + 1,
                                    dtype=jnp.int32)
    weights = init_params(kp, vocab_size=vocab_size, num_hiddens=num_hiddens,
                          ffn_num_hiddens=ffn_num_hiddens, num_heads=num_heads,
                          num_layers=num_layers, max_len=max_len)

    fwd = jax.jit(functools.partial(bert_encoder_forward, num_heads=num_heads))
    out = fwd(tokens, segments, valid_lens, weights)
    out = jax.block_until_ready(out)
    assert out.shape == (batch_size, seq_len, num_hiddens)

    ref = reference_forward(tokens, segments, valid_lens, weights,
                            num_heads=num_heads)
    # bf16 MXU matmuls + approx reciprocal in the kernel vs an f32 HIGHEST
    # reference -> loosened tolerance.
    assert jnp.allclose(out, ref, atol=2.5e-2, rtol=2.5e-2), "mismatch vs reference"

    print("KERNEL_OK")
</pallas_src>

<mosaic_0001>
module attributes {stable_mosaic.version = 11 : i64} {
  func.func @encoder_block_kernel(%arg0: i32, %arg1: i32, %arg2: memref<2xi32, #tpu.memory_space<smem>>, %arg3: memref<1x16x32xf32, #tpu.memory_space<vmem>>, %arg4: memref<32x96xbf16, #tpu.memory_space<vmem>>, %arg5: memref<1x96xf32, #tpu.memory_space<vmem>>, %arg6: memref<32x32xbf16, #tpu.memory_space<vmem>>, %arg7: memref<32x64xbf16, #tpu.memory_space<vmem>>, %arg8: memref<1x64xf32, #tpu.memory_space<vmem>>, %arg9: memref<64x32xbf16, #tpu.memory_space<vmem>>, %arg10: memref<6x32xf32, #tpu.memory_space<vmem>>, %arg11: memref<1x8x32xf32, #tpu.memory_space<vmem>>, %arg12: memref<8x32xf32, #tpu.memory_space<vmem>>) attributes {dimension_semantics = [#tpu.dimension_semantics<parallel>, #tpu.dimension_semantics<parallel>], iteration_bounds = array<i64: 2, 2>, scalar_prefetch = 1 : i64, scratch_operands = 1 : i64, tpu.core_type = #tpu.core_type<tc>, window_params = [{transform_indices = @transform_0, window_bounds = array<i64: 1, 16, 32>}, {pipeline_mode = #tpu.pipeline_mode<synchronous>, transform_indices = @transform_1, window_bounds = array<i64: 32, 96>}, {pipeline_mode = #tpu.pipeline_mode<synchronous>, transform_indices = @transform_2, window_bounds = array<i64: 1, 96>}, {pipeline_mode = #tpu.pipeline_mode<synchronous>, transform_indices = @transform_3, window_bounds = array<i64: 32, 32>}, {pipeline_mode = #tpu.pipeline_mode<synchronous>, transform_indices = @transform_4, window_bounds = array<i64: 32, 64>}, {pipeline_mode = #tpu.pipeline_mode<synchronous>, transform_indices = @transform_5, window_bounds = array<i64: 1, 64>}, {pipeline_mode = #tpu.pipeline_mode<synchronous>, transform_indices = @transform_6, window_bounds = array<i64: 64, 32>}, {pipeline_mode = #tpu.pipeline_mode<synchronous>, transform_indices = @transform_7, window_bounds = array<i64: 6, 32>}, {transform_indices = @transform_8, window_bounds = array<i64: 1, 8, 32>}]} {
    %c0 = arith.constant 0 : index
    %c0_0 = arith.constant 0 : index
    %c0_1 = arith.constant 0 : index
    %0 = vector.load %arg3[%c0, %c0_0, %c0_1] : memref<1x16x32xf32, #tpu.memory_space<vmem>>, vector<1x16x32xf32>
    %1 = vector.shape_cast %0 : vector<1x16x32xf32> to vector<16x32xf32>
    %c8_i32 = arith.constant 8 : i32
    %2 = arith.muli %arg1, %c8_i32 : i32
    %3 = tpu.assume_multiple %2, 8 : i32
    %c0_2 = arith.constant 0 : index
    %4 = arith.index_cast %3 : i32 to index
    %c0_3 = arith.constant 0 : index
    %5 = vector.load %arg3[%c0_2, %4, %c0_3] : memref<1x16x32xf32, #tpu.memory_space<vmem>>, vector<1x8x32xf32>
    %6 = vector.shape_cast %5 : vector<1x8x32xf32> to vector<8x32xf32>
    %7 = arith.truncf %1 : vector<16x32xf32> to vector<16x32xbf16>
    %8 = arith.truncf %6 : vector<8x32xf32> to vector<8x32xbf16>
    %c0_4 = arith.constant 0 : index
    %c0_5 = arith.constant 0 : index
    %9 = vector.load %arg4[%c0_4, %c0_5] : memref<32x96xbf16, #tpu.memory_space<vmem>>, vector<32x96xbf16>
    %c0_6 = arith.constant 0 : index
    %c0_7 = arith.constant 0 : index
    %10 = vector.load %arg5[%c0_6, %c0_7] : memref<1x96xf32, #tpu.memory_space<vmem>>, vector<1x96xf32>
    %11 = vector.extract_strided_slice %9 {offsets = [0, 32], sizes = [32, 64], strides = [1, 1]} : vector<32x96xbf16> to vector<32x64xbf16>
    %cst = arith.constant dense<0.000000e+00> : vector<16x64xf32>
    %12 = tpu.matmul %7, %11, %cst {dimension_numbers = #tpu.dot_dimension_numbers<[1], [0], [0], [1], [0, 0, 1, 1], [], []>} : vector<16x32xbf16>, vector<32x64xbf16>, vector<16x64xf32> -> vector<16x64xf32>
    %13 = vector.extract_strided_slice %10 {offsets = [0, 32], sizes = [1, 64], strides = [1, 1]} : vector<1x96xf32> to vector<1x64xf32>
    %14 = vector.broadcast %13 : vector<1x64xf32> to vector<16x64xf32>
    %15 = arith.addf %12, %14 : vector<16x64xf32>
    %16 = vector.extract_strided_slice %15 {offsets = [0, 0], sizes = [16, 32], strides = [1, 1]} : vector<16x64xf32> to vector<16x32xf32>
    %17 = vector.extract_strided_slice %15 {offsets = [0, 32], sizes = [16, 32], strides = [1, 1]} : vector<16x64xf32> to vector<16x32xf32>
    %18 = vector.extract_strided_slice %9 {offsets = [0, 0], sizes = [32, 32], strides = [1, 1]} : vector<32x96xbf16> to vector<32x32xbf16>
    %cst_8 = arith.constant dense<0.000000e+00> : vector<8x32xf32>
    %19 = tpu.matmul %8, %18, %cst_8 {dimension_numbers = #tpu.dot_dimension_numbers<[1], [0], [0], [1], [0, 0, 1, 1], [], []>} : vector<8x32xbf16>, vector<32x32xbf16>, vector<8x32xf32> -> vector<8x32xf32>
    %20 = vector.extract_strided_slice %10 {offsets = [0, 0], sizes = [1, 32], strides = [1, 1]} : vector<1x96xf32> to vector<1x32xf32>
    %21 = vector.broadcast %20 : vector<1x32xf32> to vector<8x32xf32>
    %22 = arith.addf %19, %21 : vector<8x32xf32>
    %23 = tpu.iota {dimensions = array<i32: 1>} : vector<1x16xi32>
    %24 = arith.index_cast %arg0 : i32 to index
    %25 = memref.load %arg2[%24] : memref<2xi32, #tpu.memory_space<smem>>
    %26 = vector.broadcast %25 : i32 to vector<1x16xi32>
    %27 = arith.cmpi slt, %23, %26 : vector<1x16xi32>
    %28 = vector.extract_strided_slice %22 {offsets = [0, 0], sizes = [8, 16], strides = [1, 1]} : vector<8x32xf32> to vector<8x16xf32>
    %29 = arith.truncf %28 : vector<8x16xf32> to vector<8x16xbf16>
    %30 = vector.extract_strided_slice %16 {offsets = [0, 0], sizes = [16, 16], strides = [1, 1]} : vector<16x32xf32> to vector<16x16xf32>
    %31 = arith.truncf %30 : vector<16x16xf32> to vector<16x16xbf16>
    %32 = vector.extract_strided_slice %17 {offsets = [0, 0], sizes = [16, 16], strides = [1, 1]} : vector<16x32xf32> to vector<16x16xf32>
    %33 = arith.truncf %32 : vector<16x16xf32> to vector<16x16xbf16>
    %cst_9 = arith.constant dense<0.000000e+00> : vector<8x16xf32>
    %34 = tpu.matmul %29, %31, %cst_9 {dimension_numbers = #tpu.dot_dimension_numbers<[1], [1], [0], [0], [0, 0, 1, 0], [], []>} : vector<8x16xbf16>, vector<16x16xbf16>, vector<8x16xf32> -> vector<8x16xf32>
    %cst_10 = arith.constant 2.500000e-01 : f32
    %35 = vector.broadcast %cst_10 : f32 to vector<8x16xf32>
    %36 = arith.mulf %34, %35 : vector<8x16xf32>
    %cst_11 = arith.constant -1.000000e+06 : f32
    %37 = vector.shape_cast %27 : vector<1x16xi1> to vector<1x16xi1>
    %38 = vector.broadcast %37 : vector<1x16xi1> to vector<8x16xi1>
    %39 = vector.broadcast %cst_11 : f32 to vector<8x16xf32>
    %40 = arith.select %38, %36, %39 : vector<8x16xi1>, vector<8x16xf32>
    %cst_12 = arith.constant dense<0xFF800000> : vector<8xf32>
    %41 = vector.multi_reduction <maximumf>, %40, %cst_12 [1] : vector<8x16xf32> to vector<8xf32>
    %42 = vector.shape_cast %41 : vector<8xf32> to vector<8x1xf32>
    %43 = vector.broadcast %42 : vector<8x1xf32> to vector<8x16xf32>
    %44 = arith.subf %40, %43 : vector<8x16xf32>
    %45 = math.exp %44 : vector<8x16xf32>
    %cst_13 = arith.constant dense<0.000000e+00> : vector<8xf32>
    %46 = vector.multi_reduction <add>, %45, %cst_13 [1] : vector<8x16xf32> to vector<8xf32>
    %47 = vector.shape_cast %46 : vector<8xf32> to vector<8x1xf32>
    %48 = tpu.reciprocal %47 {approx = true} : vector<8x1xf32> -> vector<8x1xf32>
    %49 = vector.broadcast %48 : vector<8x1xf32> to vector<8x16xf32>
    %50 = arith.mulf %45, %49 : vector<8x16xf32>
    %51 = arith.truncf %50 : vector<8x16xf32> to vector<8x16xbf16>
    %cst_14 = arith.constant dense<0.000000e+00> : vector<8x16xf32>
    %52 = tpu.matmul %51, %33, %cst_14 {dimension_numbers = #tpu.dot_dimension_numbers<[1], [0], [0], [1], [0, 0, 1, 1], [], []>} : vector<8x16xbf16>, vector<16x16xbf16>, vector<8x16xf32> -> vector<8x16xf32>
    %c0_15 = arith.constant 0 : index
    %c0_16 = arith.constant 0 : index
    %53 = vector.load %arg12[%c0_15, %c0_16] : memref<8x32xf32, #tpu.memory_space<vmem>>, vector<8x16xf32>
    tpu.vector_store %arg12[%c0_15, %c0_16], %52 {strides = array<i32>} : memref<8x32xf32, #tpu.memory_space<vmem>>, vector<8x16xf32>,
    %54 = vector.extract_strided_slice %22 {offsets = [0, 16], sizes = [8, 16], strides = [1, 1]} : vector<8x32xf32> to vector<8x16xf32>
    %55 = arith.truncf %54 : vector<8x16xf32> to vector<8x16xbf16>
    %56 = vector.extract_strided_slice %16 {offsets = [0, 16], sizes = [16, 16], strides = [1, 1]} : vector<16x32xf32> to vector<16x16xf32>
    %57 = arith.truncf %56 : vector<16x16xf32> to vector<16x16xbf16>
    %58 = vector.extract_strided_slice %17 {offsets = [0, 16], sizes = [16, 16], strides = [1, 1]} : vector<16x32xf32> to vector<16x16xf32>
    %59 = arith.truncf %58 : vector<16x16xf32> to vector<16x16xbf16>
    %cst_17 = arith.constant dense<0.000000e+00> : vector<8x16xf32>
    %60 = tpu.matmul %55, %57, %cst_17 {dimension_numbers = #tpu.dot_dimension_numbers<[1], [1], [0], [0], [0, 0, 1, 0], [], []>} : vector<8x16xbf16>, vector<16x16xbf16>, vector<8x16xf32> -> vector<8x16xf32>
    %cst_18 = arith.constant 2.500000e-01 : f32
    %61 = vector.broadcast %cst_18 : f32 to vector<8x16xf32>
    %62 = arith.mulf %60, %61 : vector<8x16xf32>
    %cst_19 = arith.constant -1.000000e+06 : f32
    %63 = vector.shape_cast %27 : vector<1x16xi1> to vector<1x16xi1>
    %64 = vector.broadcast %63 : vector<1x16xi1> to vector<8x16xi1>
    %65 = vector.broadcast %cst_19 : f32 to vector<8x16xf32>
    %66 = arith.select %64, %62, %65 : vector<8x16xi1>, vector<8x16xf32>
    %cst_20 = arith.constant dense<0xFF800000> : vector<8xf32>
    %67 = vector.multi_reduction <maximumf>, %66, %cst_20 [1] : vector<8x16xf32> to vector<8xf32>
    %68 = vector.shape_cast %67 : vector<8xf32> to vector<8x1xf32>
    %69 = vector.broadcast %68 : vector<8x1xf32> to vector<8x16xf32>
    %70 = arith.subf %66, %69 : vector<8x16xf32>
    %71 = math.exp %70 : vector<8x16xf32>
    %cst_21 = arith.constant dense<0.000000e+00> : vector<8xf32>
    %72 = vector.multi_reduction <add>, %71, %cst_21 [1] : vector<8x16xf32> to vector<8xf32>
    %73 = vector.shape_cast %72 : vector<8xf32> to vector<8x1xf32>
    %74 = tpu.reciprocal %73 {approx = true} : vector<8x1xf32> -> vector<8x1xf32>
    %75 = vector.broadcast %74 : vector<8x1xf32> to vector<8x16xf32>
    %76 = arith.mulf %71, %75 : vector<8x16xf32>
    %77 = arith.truncf %76 : vector<8x16xf32> to vector<8x16xbf16>
    %cst_22 = arith.constant dense<0.000000e+00> : vector<8x16xf32>
    %78 = tpu.matmul %77, %59, %cst_22 {dimension_numbers = #tpu.dot_dimension_numbers<[1], [0], [0], [1], [0, 0, 1, 1], [], []>} : vector<8x16xbf16>, vector<16x16xbf16>, vector<8x16xf32> -> vector<8x16xf32>
    %c0_23 = arith.constant 0 : index
    %c16 = arith.constant 16 : index
    %79 = vector.load %arg12[%c0_23, %c16] : memref<8x32xf32, #tpu.memory_space<vmem>>, vector<8x16xf32>
    tpu.vector_store %arg12[%c0_23, %c16], %78 {strides = array<i32>} : memref<8x32xf32, #tpu.memory_space<vmem>>, vector<8x16xf32>,
    %c0_24 = arith.constant 0 : index
    %c0_25 = arith.constant 0 : index
    %80 = vector.load %arg10[%c0_24, %c0_25] : memref<6x32xf32, #tpu.memory_space<vmem>>, vector<6x32xf32>
    %81 = vector.extract_strided_slice %80 {offsets = [0, 0], sizes = [1, 32], strides = [1, 1]} : vector<6x32xf32> to vector<1x32xf32>
    %82 = vector.extract_strided_slice %80 {offsets = [1, 0], sizes = [1, 32], strides = [1, 1]} : vector<6x32xf32> to vector<1x32xf32>
    %83 = vector.extract_strided_slice %80 {offsets = [2, 0], sizes = [1, 32], strides = [1, 1]} : vector<6x32xf32> to vector<1x32xf32>
    %84 = vector.extract_strided_slice %80 {offsets = [3, 0], sizes = [1, 32], strides = [1, 1]} : vector<6x32xf32> to vector<1x32xf32>
    %85 = vector.extract_strided_slice %80 {offsets = [4, 0], sizes = [1, 32], strides = [1, 1]} : vector<6x32xf32> to vector<1x32xf32>
    %86 = vector.extract_strided_slice %80 {offsets = [5, 0], sizes = [1, 32], strides = [1, 1]} : vector<6x32xf32> to vector<1x32xf32>
    %c0_26 = arith.constant 0 : index
    %c0_27 = arith.constant 0 : index
    %87 = vector.load %arg12[%c0_26, %c0_27] : memref<8x32xf32, #tpu.memory_space<vmem>>, vector<8x32xf32>
    %88 = arith.truncf %87 : vector<8x32xf32> to vector<8x32xbf16>
    %c0_28 = arith.constant 0 : index
    %c0_29 = arith.constant 0 : index
    %89 = vector.load %arg6[%c0_28, %c0_29] : memref<32x32xbf16, #tpu.memory_space<vmem>>, vector<32x32xbf16>
    %cst_30 = arith.constant dense<0.000000e+00> : vector<8x32xf32>
    %90 = tpu.matmul %88, %89, %cst_30 {dimension_numbers = #tpu.dot_dimension_numbers<[1], [0], [0], [1], [0, 0, 1, 1], [], []>} : vector<8x32xbf16>, vector<32x32xbf16>, vector<8x32xf32> -> vector<8x32xf32>
    %91 = vector.broadcast %81 : vector<1x32xf32> to vector<8x32xf32>
    %92 = arith.addf %90, %91 : vector<8x32xf32>
    %93 = arith.addf %6, %92 : vector<8x32xf32>
    %cst_31 = arith.constant dense<0.000000e+00> : vector<8xf32>
    %94 = vector.multi_reduction <add>, %93, %cst_31 [1] : vector<8x32xf32> to vector<8xf32>
    %95 = vector.shape_cast %94 : vector<8xf32> to vector<8x1xf32>
    %cst_32 = arith.constant 3.200000e+01 : f32
    %96 = vector.broadcast %cst_32 : f32 to vector<8x1xf32>
    %97 = arith.divf %95, %96 : vector<8x1xf32>
    %98 = vector.broadcast %97 : vector<8x1xf32> to vector<8x32xf32>
    %99 = arith.subf %93, %98 : vector<8x32xf32>
    %100 = arith.mulf %99, %99 : vector<8x32xf32>
    %cst_33 = arith.constant dense<0.000000e+00> : vector<8xf32>
    %101 = vector.multi_reduction <add>, %100, %cst_33 [1] : vector<8x32xf32> to vector<8xf32>
    %102 = vector.shape_cast %101 : vector<8xf32> to vector<8x1xf32>
    %cst_34 = arith.constant 3.200000e+01 : f32
    %103 = vector.broadcast %cst_34 : f32 to vector<8x1xf32>
    %104 = arith.divf %102, %103 : vector<8x1xf32>
    %cst_35 = arith.constant 9.99999974E-6 : f32
    %105 = vector.broadcast %cst_35 : f32 to vector<8x1xf32>
    %106 = arith.addf %104, %105 : vector<8x1xf32>
    %107 = math.rsqrt %106 : vector<8x1xf32>
    %108 = vector.broadcast %107 : vector<8x1xf32> to vector<8x32xf32>
    %109 = arith.mulf %99, %108 : vector<8x32xf32>
    %110 = vector.broadcast %82 : vector<1x32xf32> to vector<8x32xf32>
    %111 = arith.mulf %109, %110 : vector<8x32xf32>
    %112 = vector.broadcast %83 : vector<1x32xf32> to vector<8x32xf32>
    %113 = arith.addf %111, %112 : vector<8x32xf32>
    %114 = arith.truncf %113 : vector<8x32xf32> to vector<8x32xbf16>
    %c0_36 = arith.constant 0 : index
    %c0_37 = arith.constant 0 : index
    %115 = vector.load %arg7[%c0_36, %c0_37] : memref<32x64xbf16, #tpu.memory_space<vmem>>, vector<32x64xbf16>
    %cst_38 = arith.constant dense<0.000000e+00> : vector<8x64xf32>
    %116 = tpu.matmul %114, %115, %cst_38 {dimension_numbers = #tpu.dot_dimension_numbers<[1], [0], [0], [1], [0, 0, 1, 1], [], []>} : vector<8x32xbf16>, vector<32x64xbf16>, vector<8x64xf32> -> vector<8x64xf32>
    %c0_39 = arith.constant 0 : index
    %c0_40 = arith.constant 0 : index
    %117 = vector.load %arg8[%c0_39, %c0_40] : memref<1x64xf32, #tpu.memory_space<vmem>>, vector<1x64xf32>
    %118 = vector.broadcast %117 : vector<1x64xf32> to vector<8x64xf32>
    %119 = arith.addf %116, %118 : vector<8x64xf32>
    %cst_41 = arith.constant 0.000000e+00 : f32
    %120 = vector.broadcast %cst_41 : f32 to vector<8x64xf32>
    %121 = arith.maximumf %119, %120 : vector<8x64xf32>
    %122 = arith.truncf %121 : vector<8x64xf32> to vector<8x64xbf16>
    %c0_42 = arith.constant 0 : index
    %c0_43 = arith.constant 0 : index
    %123 = vector.load %arg9[%c0_42, %c0_43] : memref<64x32xbf16, #tpu.memory_space<vmem>>, vector<64x32xbf16>
    %cst_44 = arith.constant dense<0.000000e+00> : vector<8x32xf32>
    %124 = tpu.matmul %122, %123, %cst_44 {dimension_numbers = #tpu.dot_dimension_numbers<[1], [0], [0], [1], [0, 0, 1, 1], [], []>} : vector<8x64xbf16>, vector<64x32xbf16>, vector<8x32xf32> -> vector<8x32xf32>
    %125 = vector.broadcast %84 : vector<1x32xf32> to vector<8x32xf32>
    %126 = arith.addf %124, %125 : vector<8x32xf32>
    %127 = arith.addf %113, %126 : vector<8x32xf32>
    %cst_45 = arith.constant dense<0.000000e+00> : vector<8xf32>
    %128 = vector.multi_reduction <add>, %127, %cst_45 [1] : vector<8x32xf32> to vector<8xf32>
    %129 = vector.shape_cast %128 : vector<8xf32> to vector<8x1xf32>
    %cst_46 = arith.constant 3.200000e+01 : f32
    %130 = vector.broadcast %cst_46 : f32 to vector<8x1xf32>
    %131 = arith.divf %129, %130 : vector<8x1xf32>
    %132 = vector.broadcast %131 : vector<8x1xf32> to vector<8x32xf32>
    %133 = arith.subf %127, %132 : vector<8x32xf32>
    %134 = arith.mulf %133, %133 : vector<8x32xf32>
    %cst_47 = arith.constant dense<0.000000e+00> : vector<8xf32>
    %135 = vector.multi_reduction <add>, %134, %cst_47 [1] : vector<8x32xf32> to vector<8xf32>
    %136 = vector.shape_cast %135 : vector<8xf32> to vector<8x1xf32>
    %cst_48 = arith.constant 3.200000e+01 : f32
    %137 = vector.broadcast %cst_48 : f32 to vector<8x1xf32>
    %138 = arith.divf %136, %137 : vector<8x1xf32>
    %cst_49 = arith.constant 9.99999974E-6 : f32
    %139 = vector.broadcast %cst_49 : f32 to vector<8x1xf32>
    %140 = arith.addf %138, %139 : vector<8x1xf32>
    %141 = math.rsqrt %140 : vector<8x1xf32>
    %142 = vector.broadcast %141 : vector<8x1xf32> to vector<8x32xf32>
    %143 = arith.mulf %133, %142 : vector<8x32xf32>
    %144 = vector.broadcast %85 : vector<1x32xf32> to vector<8x32xf32>
    %145 = arith.mulf %143, %144 : vector<8x32xf32>
    %146 = vector.broadcast %86 : vector<1x32xf32> to vector<8x32xf32>
    %147 = arith.addf %145, %146 : vector<8x32xf32>
    %c0_50 = arith.constant 0 : index
    %c0_51 = arith.constant 0 : index
    %c0_52 = arith.constant 0 : index
    %148 = vector.load %arg11[%c0_50, %c0_51, %c0_52] : memref<1x8x32xf32, #tpu.memory_space<vmem>>, vector<1x8x32xf32>
    %149 = vector.shape_cast %148 : vector<1x8x32xf32> to vector<8x32xf32>
    %150 = vector.shape_cast %147 : vector<8x32xf32> to vector<1x8x32xf32>
    tpu.vector_store %arg11[%c0_50, %c0_51, %c0_52], %150 {strides = array<i32>} : memref<1x8x32xf32, #tpu.memory_space<vmem>>, vector<1x8x32xf32>,
    return
  }
  func.func @transform_0(%arg0: i32, %arg1: i32, %arg2: memref<2xi32, #tpu.memory_space<smem>>) -> (i32, i32, i32) {
    %c0_i32 = arith.constant 0 : i32
    %c0_i32_0 = arith.constant 0 : i32
    %c0_i32_1 = arith.constant 0 : i32
    return %arg0, %c0_i32, %c0_i32_0 : i32, i32, i32
  }
  func.func @transform_1(%arg0: i32, %arg1: i32, %arg2: memref<2xi32, #tpu.memory_space<smem>>) -> (i32, i32) {
    %c0_i32 = arith.constant 0 : i32
    %c0_i32_0 = arith.constant 0 : i32
    %c0_i32_1 = arith.constant 0 : i32
    return %c0_i32, %c0_i32_0 : i32, i32
  }
  func.func @transform_2(%arg0: i32, %arg1: i32, %arg2: memref<2xi32, #tpu.memory_space<smem>>) -> (i32, i32) {
    %c0_i32 = arith.constant 0 : i32
    %c0_i32_0 = arith.constant 0 : i32
    %c0_i32_1 = arith.constant 0 : i32
    return %c0_i32, %c0_i32_0 : i32, i32
  }
  func.func @transform_3(%arg0: i32, %arg1: i32, %arg2: memref<2xi32, #tpu.memory_space<smem>>) -> (i32, i32) {
    %c0_i32 = arith.constant 0 : i32
    %c0_i32_0 = arith.constant 0 : i32
    %c0_i32_1 = arith.constant 0 : i32
    return %c0_i32, %c0_i32_0 : i32, i32
  }
  func.func @transform_4(%arg0: i32, %arg1: i32, %arg2: memref<2xi32, #tpu.memory_space<smem>>) -> (i32, i32) {
    %c0_i32 = arith.constant 0 : i32
    %c0_i32_0 = arith.constant 0 : i32
    %c0_i32_1 = arith.constant 0 : i32
    return %c0_i32, %c0_i32_0 : i32, i32
  }
  func.func @transform_5(%arg0: i32, %arg1: i32, %arg2: memref<2xi32, #tpu.memory_space<smem>>) -> (i32, i32) {
    %c0_i32 = arith.constant 0 : i32
    %c0_i32_0 = arith.constant 0 : i32
    %c0_i32_1 = arith.constant 0 : i32
    return %c0_i32, %c0_i32_0 : i32, i32
  }
  func.func @transform_6(%arg0: i32, %arg1: i32, %arg2: memref<2xi32, #tpu.memory_space<smem>>) -> (i32, i32) {
    %c0_i32 = arith.constant 0 : i32
    %c0_i32_0 = arith.constant 0 : i32
    %c0_i32_1 = arith.constant 0 : i32
    return %c0_i32, %c0_i32_0 : i32, i32
  }
  func.func @transform_7(%arg0: i32, %arg1: i32, %arg2: memref<2xi32, #tpu.memory_space<smem>>) -> (i32, i32) {
    %c0_i32 = arith.constant 0 : i32
    %c0_i32_0 = arith.constant 0 : i32
    %c0_i32_1 = arith.constant 0 : i32
    return %c0_i32, %c0_i32_0 : i32, i32
  }
  func.func @transform_8(%arg0: i32, %arg1: i32, %arg2: memref<2xi32, #tpu.memory_space<smem>>) -> (i32, i32, i32) {
    %c0_i32 = arith.constant 0 : i32
    %c0_i32_0 = arith.constant 0 : i32
    return %arg0, %arg1, %c0_i32 : i32, i32, i32
  }
}

module attributes {stable_mosaic.version = 11 : i64} {
  func.func @encoder_block_kernel(%arg0: i32, %arg1: i32, %arg2: memref<2xi32, #tpu.memory_space<smem>>, %arg3: memref<1x16x32xf32, #tpu.memory_space<vmem>>, %arg4: memref<32x96xbf16, #tpu.memory_space<vmem>>, %arg5: memref<1x96xf32, #tpu.memory_space<vmem>>, %arg6: memref<32x32xbf16, #tpu.memory_space<vmem>>, %arg7: memref<32x64xbf16, #tpu.memory_space<vmem>>, %arg8: memref<1x64xf32, #tpu.memory_space<vmem>>, %arg9: memref<64x32xbf16, #tpu.memory_space<vmem>>, %arg10: memref<6x32xf32, #tpu.memory_space<vmem>>, %arg11: memref<1x8x32xf32, #tpu.memory_space<vmem>>, %arg12: memref<8x32xf32, #tpu.memory_space<vmem>>) attributes {dimension_semantics = [#tpu.dimension_semantics<parallel>, #tpu.dimension_semantics<parallel>], iteration_bounds = array<i64: 2, 2>, scalar_prefetch = 1 : i64, scratch_operands = 1 : i64, tpu.core_type = #tpu.core_type<tc>, window_params = [{transform_indices = @transform_0, window_bounds = array<i64: 1, 16, 32>}, {pipeline_mode = #tpu.pipeline_mode<synchronous>, transform_indices = @transform_1, window_bounds = array<i64: 32, 96>}, {pipeline_mode = #tpu.pipeline_mode<synchronous>, transform_indices = @transform_2, window_bounds = array<i64: 1, 96>}, {pipeline_mode = #tpu.pipeline_mode<synchronous>, transform_indices = @transform_3, window_bounds = array<i64: 32, 32>}, {pipeline_mode = #tpu.pipeline_mode<synchronous>, transform_indices = @transform_4, window_bounds = array<i64: 32, 64>}, {pipeline_mode = #tpu.pipeline_mode<synchronous>, transform_indices = @transform_5, window_bounds = array<i64: 1, 64>}, {pipeline_mode = #tpu.pipeline_mode<synchronous>, transform_indices = @transform_6, window_bounds = array<i64: 64, 32>}, {pipeline_mode = #tpu.pipeline_mode<synchronous>, transform_indices = @transform_7, window_bounds = array<i64: 6, 32>}, {transform_indices = @transform_8, window_bounds = array<i64: 1, 8, 32>}]} {
    %c0 = arith.constant 0 : index
    %c0_0 = arith.constant 0 : index
    %c0_1 = arith.constant 0 : index
    %0 = vector.load %arg3[%c0, %c0_0, %c0_1] : memref<1x16x32xf32, #tpu.memory_space<vmem>>, vector<1x16x32xf32>
    %1 = vector.shape_cast %0 : vector<1x16x32xf32> to vector<16x32xf32>
    %c8_i32 = arith.constant 8 : i32
    %2 = arith.muli %arg1, %c8_i32 : i32
    %3 = tpu.assume_multiple %2, 8 : i32
    %c0_2 = arith.constant 0 : index
    %4 = arith.index_cast %3 : i32 to index
    %c0_3 = arith.constant 0 : index
    %5 = vector.load %arg3[%c0_2, %4, %c0_3] : memref<1x16x32xf32, #tpu.memory_space<vmem>>, vector<1x8x32xf32>
    %6 = vector.shape_cast %5 : vector<1x8x32xf32> to vector<8x32xf32>
    %7 = arith.truncf %1 : vector<16x32xf32> to vector<16x32xbf16>
    %8 = arith.truncf %6 : vector<8x32xf32> to vector<8x32xbf16>
    %c0_4 = arith.constant 0 : index
    %c0_5 = arith.constant 0 : index
    %9 = vector.load %arg4[%c0_4, %c0_5] : memref<32x96xbf16, #tpu.memory_space<vmem>>, vector<32x96xbf16>
    %c0_6 = arith.constant 0 : index
    %c0_7 = arith.constant 0 : index
    %10 = vector.load %arg5[%c0_6, %c0_7] : memref<1x96xf32, #tpu.memory_space<vmem>>, vector<1x96xf32>
    %11 = vector.extract_strided_slice %9 {offsets = [0, 32], sizes = [32, 64], strides = [1, 1]} : vector<32x96xbf16> to vector<32x64xbf16>
    %cst = arith.constant dense<0.000000e+00> : vector<16x64xf32>
    %12 = tpu.matmul %7, %11, %cst {dimension_numbers = #tpu.dot_dimension_numbers<[1], [0], [0], [1], [0, 0, 1, 1], [], []>} : vector<16x32xbf16>, vector<32x64xbf16>, vector<16x64xf32> -> vector<16x64xf32>
    %13 = vector.extract_strided_slice %10 {offsets = [0, 32], sizes = [1, 64], strides = [1, 1]} : vector<1x96xf32> to vector<1x64xf32>
    %14 = vector.broadcast %13 : vector<1x64xf32> to vector<16x64xf32>
    %15 = arith.addf %12, %14 : vector<16x64xf32>
    %16 = vector.extract_strided_slice %15 {offsets = [0, 0], sizes = [16, 32], strides = [1, 1]} : vector<16x64xf32> to vector<16x32xf32>
    %17 = vector.extract_strided_slice %15 {offsets = [0, 32], sizes = [16, 32], strides = [1, 1]} : vector<16x64xf32> to vector<16x32xf32>
    %18 = vector.extract_strided_slice %9 {offsets = [0, 0], sizes = [32, 32], strides = [1, 1]} : vector<32x96xbf16> to vector<32x32xbf16>
    %cst_8 = arith.constant dense<0.000000e+00> : vector<8x32xf32>
    %19 = tpu.matmul %8, %18, %cst_8 {dimension_numbers = #tpu.dot_dimension_numbers<[1], [0], [0], [1], [0, 0, 1, 1], [], []>} : vector<8x32xbf16>, vector<32x32xbf16>, vector<8x32xf32> -> vector<8x32xf32>
    %20 = vector.extract_strided_slice %10 {offsets = [0, 0], sizes = [1, 32], strides = [1, 1]} : vector<1x96xf32> to vector<1x32xf32>
    %21 = vector.broadcast %20 : vector<1x32xf32> to vector<8x32xf32>
    %22 = arith.addf %19, %21 : vector<8x32xf32>
    %23 = tpu.iota {dimensions = array<i32: 1>} : vector<1x16xi32>
    %24 = arith.index_cast %arg0 : i32 to index
    %25 = memref.load %arg2[%24] : memref<2xi32, #tpu.memory_space<smem>>
    %26 = vector.broadcast %25 : i32 to vector<1x16xi32>
    %27 = arith.cmpi slt, %23, %26 : vector<1x16xi32>
    %28 = vector.extract_strided_slice %22 {offsets = [0, 0], sizes = [8, 16], strides = [1, 1]} : vector<8x32xf32> to vector<8x16xf32>
    %29 = arith.truncf %28 : vector<8x16xf32> to vector<8x16xbf16>
    %30 = vector.extract_strided_slice %16 {offsets = [0, 0], sizes = [16, 16], strides = [1, 1]} : vector<16x32xf32> to vector<16x16xf32>
    %31 = arith.truncf %30 : vector<16x16xf32> to vector<16x16xbf16>
    %32 = vector.extract_strided_slice %17 {offsets = [0, 0], sizes = [16, 16], strides = [1, 1]} : vector<16x32xf32> to vector<16x16xf32>
    %33 = arith.truncf %32 : vector<16x16xf32> to vector<16x16xbf16>
    %cst_9 = arith.constant dense<0.000000e+00> : vector<8x16xf32>
    %34 = tpu.matmul %29, %31, %cst_9 {dimension_numbers = #tpu.dot_dimension_numbers<[1], [1], [0], [0], [0, 0, 1, 0], [], []>} : vector<8x16xbf16>, vector<16x16xbf16>, vector<8x16xf32> -> vector<8x16xf32>
    %cst_10 = arith.constant 2.500000e-01 : f32
    %35 = vector.broadcast %cst_10 : f32 to vector<8x16xf32>
    %36 = arith.mulf %34, %35 : vector<8x16xf32>
    %cst_11 = arith.constant -1.000000e+06 : f32
    %37 = vector.shape_cast %27 : vector<1x16xi1> to vector<1x16xi1>
    %38 = vector.broadcast %37 : vector<1x16xi1> to vector<8x16xi1>
    %39 = vector.broadcast %cst_11 : f32 to vector<8x16xf32>
    %40 = arith.select %38, %36, %39 : vector<8x16xi1>, vector<8x16xf32>
    %cst_12 = arith.constant dense<0xFF800000> : vector<8xf32>
    %41 = vector.multi_reduction <maximumf>, %40, %cst_12 [1] : vector<8x16xf32> to vector<8xf32>
    %42 = vector.shape_cast %41 : vector<8xf32> to vector<8x1xf32>
    %43 = vector.broadcast %42 : vector<8x1xf32> to vector<8x16xf32>
    %44 = arith.subf %40, %43 : vector<8x16xf32>
    %45 = math.exp %44 : vector<8x16xf32>
    %cst_13 = arith.constant dense<0.000000e+00> : vector<8xf32>
    %46 = vector.multi_reduction <add>, %45, %cst_13 [1] : vector<8x16xf32> to vector<8xf32>
    %47 = vector.shape_cast %46 : vector<8xf32> to vector<8x1xf32>
    %48 = tpu.reciprocal %47 {approx = true} : vector<8x1xf32> -> vector<8x1xf32>
    %49 = vector.broadcast %48 : vector<8x1xf32> to vector<8x16xf32>
    %50 = arith.mulf %45, %49 : vector<8x16xf32>
    %51 = arith.truncf %50 : vector<8x16xf32> to vector<8x16xbf16>
    %cst_14 = arith.constant dense<0.000000e+00> : vector<8x16xf32>
    %52 = tpu.matmul %51, %33, %cst_14 {dimension_numbers = #tpu.dot_dimension_numbers<[1], [0], [0], [1], [0, 0, 1, 1], [], []>} : vector<8x16xbf16>, vector<16x16xbf16>, vector<8x16xf32> -> vector<8x16xf32>
    %c0_15 = arith.constant 0 : index
    %c0_16 = arith.constant 0 : index
    %53 = vector.load %arg12[%c0_15, %c0_16] : memref<8x32xf32, #tpu.memory_space<vmem>>, vector<8x16xf32>
    tpu.vector_store %arg12[%c0_15, %c0_16], %52 {strides = array<i32>} : memref<8x32xf32, #tpu.memory_space<vmem>>, vector<8x16xf32>,
    %54 = vector.extract_strided_slice %22 {offsets = [0, 16], sizes = [8, 16], strides = [1, 1]} : vector<8x32xf32> to vector<8x16xf32>
    %55 = arith.truncf %54 : vector<8x16xf32> to vector<8x16xbf16>
    %56 = vector.extract_strided_slice %16 {offsets = [0, 16], sizes = [16, 16], strides = [1, 1]} : vector<16x32xf32> to vector<16x16xf32>
    %57 = arith.truncf %56 : vector<16x16xf32> to vector<16x16xbf16>
    %58 = vector.extract_strided_slice %17 {offsets = [0, 16], sizes = [16, 16], strides = [1, 1]} : vector<16x32xf32> to vector<16x16xf32>
    %59 = arith.truncf %58 : vector<16x16xf32> to vector<16x16xbf16>
    %cst_17 = arith.constant dense<0.000000e+00> : vector<8x16xf32>
    %60 = tpu.matmul %55, %57, %cst_17 {dimension_numbers = #tpu.dot_dimension_numbers<[1], [1], [0], [0], [0, 0, 1, 0], [], []>} : vector<8x16xbf16>, vector<16x16xbf16>, vector<8x16xf32> -> vector<8x16xf32>
    %cst_18 = arith.constant 2.500000e-01 : f32
    %61 = vector.broadcast %cst_18 : f32 to vector<8x16xf32>
    %62 = arith.mulf %60, %61 : vector<8x16xf32>
    %cst_19 = arith.constant -1.000000e+06 : f32
    %63 = vector.shape_cast %27 : vector<1x16xi1> to vector<1x16xi1>
    %64 = vector.broadcast %63 : vector<1x16xi1> to vector<8x16xi1>
    %65 = vector.broadcast %cst_19 : f32 to vector<8x16xf32>
    %66 = arith.select %64, %62, %65 : vector<8x16xi1>, vector<8x16xf32>
    %cst_20 = arith.constant dense<0xFF800000> : vector<8xf32>
    %67 = vector.multi_reduction <maximumf>, %66, %cst_20 [1] : vector<8x16xf32> to vector<8xf32>
    %68 = vector.shape_cast %67 : vector<8xf32> to vector<8x1xf32>
    %69 = vector.broadcast %68 : vector<8x1xf32> to vector<8x16xf32>
    %70 = arith.subf %66, %69 : vector<8x16xf32>
    %71 = math.exp %70 : vector<8x16xf32>
    %cst_21 = arith.constant dense<0.000000e+00> : vector<8xf32>
    %72 = vector.multi_reduction <add>, %71, %cst_21 [1] : vector<8x16xf32> to vector<8xf32>
    %73 = vector.shape_cast %72 : vector<8xf32> to vector<8x1xf32>
    %74 = tpu.reciprocal %73 {approx = true} : vector<8x1xf32> -> vector<8x1xf32>
    %75 = vector.broadcast %74 : vector<8x1xf32> to vector<8x16xf32>
    %76 = arith.mulf %71, %75 : vector<8x16xf32>
    %77 = arith.truncf %76 : vector<8x16xf32> to vector<8x16xbf16>
    %cst_22 = arith.constant dense<0.000000e+00> : vector<8x16xf32>
    %78 = tpu.matmul %77, %59, %cst_22 {dimension_numbers = #tpu.dot_dimension_numbers<[1], [0], [0], [1], [0, 0, 1, 1], [], []>} : vector<8x16xbf16>, vector<16x16xbf16>, vector<8x16xf32> -> vector<8x16xf32>
    %c0_23 = arith.constant 0 : index
    %c16 = arith.constant 16 : index
    %79 = vector.load %arg12[%c0_23, %c16] : memref<8x32xf32, #tpu.memory_space<vmem>>, vector<8x16xf32>
    tpu.vector_store %arg12[%c0_23, %c16], %78 {strides = array<i32>} : memref<8x32xf32, #tpu.memory_space<vmem>>, vector<8x16xf32>,
    %c0_24 = arith.constant 0 : index
    %c0_25 = arith.constant 0 : index
    %80 = vector.load %arg10[%c0_24, %c0_25] : memref<6x32xf32, #tpu.memory_space<vmem>>, vector<6x32xf32>
    %81 = vector.extract_strided_slice %80 {offsets = [0, 0], sizes = [1, 32], strides = [1, 1]} : vector<6x32xf32> to vector<1x32xf32>
    %82 = vector.extract_strided_slice %80 {offsets = [1, 0], sizes = [1, 32], strides = [1, 1]} : vector<6x32xf32> to vector<1x32xf32>
    %83 = vector.extract_strided_slice %80 {offsets = [2, 0], sizes = [1, 32], strides = [1, 1]} : vector<6x32xf32> to vector<1x32xf32>
    %84 = vector.extract_strided_slice %80 {offsets = [3, 0], sizes = [1, 32], strides = [1, 1]} : vector<6x32xf32> to vector<1x32xf32>
    %85 = vector.extract_strided_slice %80 {offsets = [4, 0], sizes = [1, 32], strides = [1, 1]} : vector<6x32xf32> to vector<1x32xf32>
    %86 = vector.extract_strided_slice %80 {offsets = [5, 0], sizes = [1, 32], strides = [1, 1]} : vector<6x32xf32> to vector<1x32xf32>
    %c0_26 = arith.constant 0 : index
    %c0_27 = arith.constant 0 : index
    %87 = vector.load %arg12[%c0_26, %c0_27] : memref<8x32xf32, #tpu.memory_space<vmem>>, vector<8x32xf32>
    %88 = arith.truncf %87 : vector<8x32xf32> to vector<8x32xbf16>
    %c0_28 = arith.constant 0 : index
    %c0_29 = arith.constant 0 : index
    %89 = vector.load %arg6[%c0_28, %c0_29] : memref<32x32xbf16, #tpu.memory_space<vmem>>, vector<32x32xbf16>
    %cst_30 = arith.constant dense<0.000000e+00> : vector<8x32xf32>
    %90 = tpu.matmul %88, %89, %cst_30 {dimension_numbers = #tpu.dot_dimension_numbers<[1], [0], [0], [1], [0, 0, 1, 1], [], []>} : vector<8x32xbf16>, vector<32x32xbf16>, vector<8x32xf32> -> vector<8x32xf32>
    %91 = vector.broadcast %81 : vector<1x32xf32> to vector<8x32xf32>
    %92 = arith.addf %90, %91 : vector<8x32xf32>
    %93 = arith.addf %6, %92 : vector<8x32xf32>
    %cst_31 = arith.constant dense<0.000000e+00> : vector<8xf32>
    %94 = vector.multi_reduction <add>, %93, %cst_31 [1] : vector<8x32xf32> to vector<8xf32>
    %95 = vector.shape_cast %94 : vector<8xf32> to vector<8x1xf32>
    %cst_32 = arith.constant 3.200000e+01 : f32
    %96 = vector.broadcast %cst_32 : f32 to vector<8x1xf32>
    %97 = arith.divf %95, %96 : vector<8x1xf32>
    %98 = vector.broadcast %97 : vector<8x1xf32> to vector<8x32xf32>
    %99 = arith.subf %93, %98 : vector<8x32xf32>
    %100 = arith.mulf %99, %99 : vector<8x32xf32>
    %cst_33 = arith.constant dense<0.000000e+00> : vector<8xf32>
    %101 = vector.multi_reduction <add>, %100, %cst_33 [1] : vector<8x32xf32> to vector<8xf32>
    %102 = vector.shape_cast %101 : vector<8xf32> to vector<8x1xf32>
    %cst_34 = arith.constant 3.200000e+01 : f32
    %103 = vector.broadcast %cst_34 : f32 to vector<8x1xf32>
    %104 = arith.divf %102, %103 : vector<8x1xf32>
    %cst_35 = arith.constant 9.99999974E-6 : f32
    %105 = vector.broadcast %cst_35 : f32 to vector<8x1xf32>
    %106 = arith.addf %104, %105 : vector<8x1xf32>
    %107 = math.rsqrt %106 : vector<8x1xf32>
    %108 = vector.broadcast %107 : vector<8x1xf32> to vector<8x32xf32>
    %109 = arith.mulf %99, %108 : vector<8x32xf32>
    %110 = vector.broadcast %82 : vector<1x32xf32> to vector<8x32xf32>
    %111 = arith.mulf %109, %110 : vector<8x32xf32>
    %112 = vector.broadcast %83 : vector<1x32xf32> to vector<8x32xf32>
    %113 = arith.addf %111, %112 : vector<8x32xf32>
    %114 = arith.truncf %113 : vector<8x32xf32> to vector<8x32xbf16>
    %c0_36 = arith.constant 0 : index
    %c0_37 = arith.constant 0 : index
    %115 = vector.load %arg7[%c0_36, %c0_37] : memref<32x64xbf16, #tpu.memory_space<vmem>>, vector<32x64xbf16>
    %cst_38 = arith.constant dense<0.000000e+00> : vector<8x64xf32>
    %116 = tpu.matmul %114, %115, %cst_38 {dimension_numbers = #tpu.dot_dimension_numbers<[1], [0], [0], [1], [0, 0, 1, 1], [], []>} : vector<8x32xbf16>, vector<32x64xbf16>, vector<8x64xf32> -> vector<8x64xf32>
    %c0_39 = arith.constant 0 : index
    %c0_40 = arith.constant 0 : index
    %117 = vector.load %arg8[%c0_39, %c0_40] : memref<1x64xf32, #tpu.memory_space<vmem>>, vector<1x64xf32>
    %118 = vector.broadcast %117 : vector<1x64xf32> to vector<8x64xf32>
    %119 = arith.addf %116, %118 : vector<8x64xf32>
    %cst_41 = arith.constant 0.000000e+00 : f32
    %120 = vector.broadcast %cst_41 : f32 to vector<8x64xf32>
    %121 = arith.maximumf %119, %120 : vector<8x64xf32>
    %122 = arith.truncf %121 : vector<8x64xf32> to vector<8x64xbf16>
    %c0_42 = arith.constant 0 : index
    %c0_43 = arith.constant 0 : index
    %123 = vector.load %arg9[%c0_42, %c0_43] : memref<64x32xbf16, #tpu.memory_space<vmem>>, vector<64x32xbf16>
    %cst_44 = arith.constant dense<0.000000e+00> : vector<8x32xf32>
    %124 = tpu.matmul %122, %123, %cst_44 {dimension_numbers = #tpu.dot_dimension_numbers<[1], [0], [0], [1], [0, 0, 1, 1], [], []>} : vector<8x64xbf16>, vector<64x32xbf16>, vector<8x32xf32> -> vector<8x32xf32>
    %125 = vector.broadcast %84 : vector<1x32xf32> to vector<8x32xf32>
    %126 = arith.addf %124, %125 : vector<8x32xf32>
    %127 = arith.addf %113, %126 : vector<8x32xf32>
    %cst_45 = arith.constant dense<0.000000e+00> : vector<8xf32>
    %128 = vector.multi_reduction <add>, %127, %cst_45 [1] : vector<8x32xf32> to vector<8xf32>
    %129 = vector.shape_cast %128 : vector<8xf32> to vector<8x1xf32>
    %cst_46 = arith.constant 3.200000e+01 : f32
    %130 = vector.broadcast %cst_46 : f32 to vector<8x1xf32>
    %131 = arith.divf %129, %130 : vector<8x1xf32>
    %132 = vector.broadcast %131 : vector<8x1xf32> to vector<8x32xf32>
    %133 = arith.subf %127, %132 : vector<8x32xf32>
    %134 = arith.mulf %133, %133 : vector<8x32xf32>
    %cst_47 = arith.constant dense<0.000000e+00> : vector<8xf32>
    %135 = vector.multi_reduction <add>, %134, %cst_47 [1] : vector<8x32xf32> to vector<8xf32>
    %136 = vector.shape_cast %135 : vector<8xf32> to vector<8x1xf32>
    %cst_48 = arith.constant 3.200000e+01 : f32
    %137 = vector.broadcast %cst_48 : f32 to vector<8x1xf32>
    %138 = arith.divf %136, %137 : vector<8x1xf32>
    %cst_49 = arith.constant 9.99999974E-6 : f32
    %139 = vector.broadcast %cst_49 : f32 to vector<8x1xf32>
    %140 = arith.addf %138, %139 : vector<8x1xf32>
    %141 = math.rsqrt %140 : vector<8x1xf32>
    %142 = vector.broadcast %141 : vector<8x1xf32> to vector<8x32xf32>
    %143 = arith.mulf %133, %142 : vector<8x32xf32>
    %144 = vector.broadcast %85 : vector<1x32xf32> to vector<8x32xf32>
    %145 = arith.mulf %143, %144 : vector<8x32xf32>
    %146 = vector.broadcast %86 : vector<1x32xf32> to vector<8x32xf32>
    %147 = arith.addf %145, %146 : vector<8x32xf32>
    %c0_50 = arith.constant 0 : index
    %c0_51 = arith.constant 0 : index
    %c0_52 = arith.constant 0 : index
    %148 = vector.load %arg11[%c0_50, %c0_51, %c0_52] : memref<1x8x32xf32, #tpu.memory_space<vmem>>, vector<1x8x32xf32>
    %149 = vector.shape_cast %148 : vector<1x8x32xf32> to vector<8x32xf32>
    %150 = vector.shape_cast %147 : vector<8x32xf32> to vector<1x8x32xf32>
    tpu.vector_store %arg11[%c0_50, %c0_51, %c0_52], %150 {strides = array<i32>} : memref<1x8x32xf32, #tpu.memory_space<vmem>>, vector<1x8x32xf32>,
    return
  }
  func.func @transform_0(%arg0: i32, %arg1: i32, %arg2: memref<2xi32, #tpu.memory_space<smem>>) -> (i32, i32, i32) {
    %c0_i32 = arith.constant 0 : i32
    %c0_i32_0 = arith.constant 0 : i32
    %c0_i32_1 = arith.constant 0 : i32
    return %arg0, %c0_i32, %c0_i32_0 : i32, i32, i32
  }
  func.func @transform_1(%arg0: i32, %arg1: i32, %arg2: memref<2xi32, #tpu.memory_space<smem>>) -> (i32, i32) {
    %c0_i32 = arith.constant 0 : i32
    %c0_i32_0 = arith.constant 0 : i32
    %c0_i32_1 = arith.constant 0 : i32
    return %c0_i32, %c0_i32_0 : i32, i32
  }
  func.func @transform_2(%arg0: i32, %arg1: i32, %arg2: memref<2xi32, #tpu.memory_space<smem>>) -> (i32, i32) {
    %c0_i32 = arith.constant 0 : i32
    %c0_i32_0 = arith.constant 0 : i32
    %c0_i32_1 = arith.constant 0 : i32
    return %c0_i32, %c0_i32_0 : i32, i32
  }
  func.func @transform_3(%arg0: i32, %arg1: i32, %arg2: memref<2xi32, #tpu.memory_space<smem>>) -> (i32, i32) {
    %c0_i32 = arith.constant 0 : i32
    %c0_i32_0 = arith.constant 0 : i32
    %c0_i32_1 = arith.constant 0 : i32
    return %c0_i32, %c0_i32_0 : i32, i32
  }
  func.func @transform_4(%arg0: i32, %arg1: i32, %arg2: memref<2xi32, #tpu.memory_space<smem>>) -> (i32, i32) {
    %c0_i32 = arith.constant 0 : i32
    %c0_i32_0 = arith.constant 0 : i32
    %c0_i32_1 = arith.constant 0 : i32
    return %c0_i32, %c0_i32_0 : i32, i32
  }
  func.func @transform_5(%arg0: i32, %arg1: i32, %arg2: memref<2xi32, #tpu.memory_space<smem>>) -> (i32, i32) {
    %c0_i32 = arith.constant 0 : i32
    %c0_i32_0 = arith.constant 0 : i32
    %c0_i32_1 = arith.constant 0 : i32
    return %c0_i32, %c0_i32_0 : i32, i32
  }
  func.func @transform_6(%arg0: i32, %arg1: i32, %arg2: memref<2xi32, #tpu.memory_space<smem>>) -> (i32, i32) {
    %c0_i32 = arith.constant 0 : i32
    %c0_i32_0 = arith.constant 0 : i32
    %c0_i32_1 = arith.constant 0 : i32
    return %c0_i32, %c0_i32_0 : i32, i32
  }
  func.func @transform_7(%arg0: i32, %arg1: i32, %arg2: memref<2xi32, #tpu.memory_space<smem>>) -> (i32, i32) {
    %c0_i32 = arith.constant 0 : i32
    %c0_i32_0 = arith.constant 0 : i32
    %c0_i32_1 = arith.constant 0 : i32
    return %c0_i32, %c0_i32_0 : i32, i32
  }
  func.func @transform_8(%arg0: i32, %arg1: i32, %arg2: memref<2xi32, #tpu.memory_space<smem>>) -> (i32, i32, i32) {
    %c0_i32 = arith.constant 0 : i32
    %c0_i32_0 = arith.constant 0 : i32
    return %arg0, %arg1, %c0_i32 : i32, i32, i32
  }
}

</mosaic_0001>

<bundles_post_ra>
// kernel: bert_encoder_forward.2
= control target key start
LH: loop header
LB: loop body
LE: loop exit
PB: predicated region body
PF: predicated region fallthrough
CT: control target
= control target key end

     0   :  { %s1538_s0 = inlined_call_operand.vmem [shape: s32[2], index: 0, kind: input, shape index: {}]   ;;  %s1539_s1 = inlined_call_operand.vmem [shape: f32[2,16,32], index: 1, kind: input, shape index: {}]   ;;  %s1540_s2 = inlined_call_operand.vmem [shape: bf16[32,96], index: 2, kind: input, shape index: {}]   ;;  %s1541_s3 = inlined_call_operand.vmem [shape: f32[1,96], index: 3, kind: input, shape index: {}]   ;;  %s1542_s4 = inlined_call_operand.vmem [shape: bf16[32,32], index: 4, kind: input, shape index: {}]   ;;  %s1543_s5 = inlined_call_operand.vmem [shape: bf16[32,64], index: 5, kind: input, shape index: {}]   ;;  %s1544_s6 = inlined_call_operand.vmem [shape: f32[1,64], index: 6, kind: input, shape index: {}]   ;;  %s1545_s7 = inlined_call_operand.vmem [shape: bf16[64,32], index: 7, kind: input, shape index: {}]   ;;  %s1546_s8 = inlined_call_operand.vmem [shape: f32[6,32], index: 8, kind: input, shape index: {}]   ;;  %s1547_s9 = inlined_call_operand.vmem [shape: f32[2,16,32], index: 9, kind: output, shape index: {}]  }
   0x1   :  { %s14_s11 = sshll.u32 %s1538_s0, 4  ;;  %s15_s11 = int_to_ptr.vmem [resolvable:$true] %s14_s11 }
   0x2   :  { %s1239_s12 = scalar_lea.vmem %s15_s11, 16  ;;  %p1244_p1 = scmp.lt.s32.totalorder %s15_s11, %s15_s11 }
   0x3   :  { %p1240_p0 = scmp.ne.s32.totalorder %s15_s11, %s1239_s12  ;;  %p1245_p2 = scmp.lt.s32.totalorder %s1239_s12, %s1239_s12 }
   0x5   :  { %p1246_p3 = por %p1245_p2, %p1244_p1 }
   0x7   :  { %p1247_p4 = pnand %p1246_p3, %p1240_p0 }
   0x9   :  { %1250 = shalt.err (!%p1247_p4)  }
   0xa   :  { %s1293_s13 = smov [#allocation4]  }
   0xb   :  { %17 = dma.vmem_to_smem %s15_s11, 16, %s1293_s13, [#allocation3] }
   0xc   :  { %1271 = dma.done.wait [#allocation3], 16 }
   0xd   :  { %1272 = vsyncadd [#allocation3], 4294967280 }
   0xe   :  { %19 = sfence }
   0xf   :  { %s1353_s14 = smov 0   ;;  %s1355_s15 = smov 0  }
  0x10   :  { %s1357_s16 = smov 0   ;;  %s1359_s0 = smov 0  }
  0x11   :  { %s1361_s17 = smov 0  }
  0x12 LB: > { %s34_s18 = sadd.s32 1, %s1283_s16  ;;  %s37_s19 = sadd.s32 1, %s1287_s0  ;;  %s1291_s17 = sphi %s1361_s17, %s25_s17   ;;  %s1287_s0 = sphi %s1359_s0, %s1551_s0   ;;  %s1283_s16 = sphi %s1357_s16, %s1550_s16   ;;  %s1279_s15 = sphi %s1355_s15, %s1549_s15   ;;  %s1275_s14 = sphi %s1353_s14, %s1548_s14  }
  0x13   : > { %p35_p5 = scmp.ge.s32.totalorder %s34_s18, 2  ;;  %p1047_p6 = scmp.ge.s32.totalorder %s1291_s17, 1 }
  0x14   : > { %p283_p7 = scmp.lt.s32.totalorder %s1291_s17, 5 }
  0x15   : > { %s1553_s18 = smov (%p35_p5, %s34_s18), 0  ;;  %s1555_s19 = smov (!%p35_p5, %s37_s19), %s1287_s0 }
  0x16   : > { %p284_p8 = pnand %p1047_p6, %p283_p7  ;;  %p39_p9 = scmp.ge.s32.totalorder %s1555_s19, 2 }
  0x17   : > { %v1217_v0 = vld [vmem:[%s1540_s2] sm:$0xff] (!%p284_p8)   ;;  %s1294_s22 = smov (!%p284_p8), 96   ;;  %v1218_v1 = vld [vmem:[%s1540_s2 + $0x8] sm:$0xff] (!%p284_p8)   ;;  %v1295_v2 = vmov (!%p284_p8), 0.0   ;;  %vm1296_vm0 = vmmov (!%p284_p8), 0   ;;  %p320_p10 = scmp.lt.s32.totalorder (!%p284_p8), %s1279_s15, 1  ;;  %v461_v29 = vlaneseq (!%p284_p8) }
  0x18   : > { %s1557_s19 = smov (%p39_p9, %s1555_s19), 0  ;;  %287 = sbr.rel (%p284_p8) target bundleno = 2635 (0xa4b), region = 52 }
  0x19   : > { %361 = vrot.lane.b32.xlu0 (!%p284_p8), %v1217_v0, %s1294_s22  ;;  %1102 = vmatprep.subr.bf16.mxu1 (!%p284_p8), %v1295_v2  ;;  %v1053_v3 = vld [vmem:[%s1541_s3] ss:$0 sm:$0xff] (!%p284_p8)  ;;  %s1052_s11 = sshll.u32 (!%p284_p8), %s1275_s14, 3  ;;  %vm370_vm1 = vcmask (!%p284_p8), 261120   ;;  %vm468_vm2 = vcmask (!%p284_p8), 130048   ;;  %s1297_s13 = smov (!%p284_p8), 112  }
  0x1a   : > { %1106 = vmatprep.mubr.msk.bf16.mxu1 (!%p284_p8), %vm1296_vm0, %v1295_v2  ;;  %1118 = vmatprep.subr.bf16.mxu0 (!%p284_p8), %v1295_v2  ;;  %s463_s20 = sld [smem:[#allocation4 + %s1279_s15]] (!%p284_p8)  ;;  %v462_v30 = vand.u32 (!%p284_p8), 127, %v461_v29  ;;  %s1299_s25 = smov (!%p284_p8), 16   ;;  %vm694_vm4 = vcmask (!%p284_p8), 261248   ;;  %vm892_vm5 = vcmask (!%p284_p8), 523264  }
  0x1b   : > { %1120 = vmatprep.mubr.msk.bf16.mxu0 (!%p284_p8), %vm1296_vm0, %v1295_v2  ;;  %367 = vrot.lane.b32.xlu1 (!%p284_p8), %v1053_v3, %s1294_s22  ;;  %p327_p11 = scmp.lt.s32.totalorder (!%p284_p8), %s1275_s14, 1 }
  0x1d   : > { %363 = vrot.lane.b32.xlu0 (!%p284_p8), %v1218_v1, %s1294_s22 }
  0x1f   : > { %s1407_s27 = scalar_select %p320_p10, %s1279_s15, 1 }
  0x20   : > { %v464_v31 = vstv %s463_s20  ;;  %s1298_s15 = smov 80   ;;  %s1559_s14 = smov (!%p327_p11, %s1275_s14), 1 }
  0x21   : > { %s1076_s28 = sshll.u32 %s1407_s27, 4  ;;  %vm465_vm3 = vcmp.lt.s32.totalorder %v462_v30, %v464_v31 }
  0x22   : > { %s324_s10 = scalar_lea.vmem %s1539_s1, %s1076_s28  ;;  %s1050_s28 = sshll.u32 %s1407_s27, 1 }
  0x23   : > { %v334_v5 = vld [vmem:[%s324_s10] sm:$0xff]  ;;  %v335_v6 = vld [vmem:[%s324_s10 + $0x8] sm:$0xff]  ;;  %s337_s12 = scalar_lea.vmem %s324_s10, %s1052_s11  ;;  %s330_s29 = sadd.s32 %s1050_s28, %s1559_s14 }
  0x24   : > { %v339_v8 = vpack.c.bf16 %v335_v6, %v334_v5  ;;  %v1419_v9 = vld [vmem:[%s337_s12] sm:$0xff]  ;;  %s1051_s30 = sshll.u32 %s330_s29, 3 }
  0x25   : > { %v340_v10 = vpack.c.bf16 %v1419_v9, %v1419_v9  ;;  %s332_s12 = scalar_lea.vmem %s1547_s9, %s1051_s30 }
  0x8b   : > { %v362_v4 = vpop.permute.xlu0 %361 }
  0x8c   : > { %1103 = vmatpush3.bf16.msra.mxu1 %v362_v4 }
  0x8d   : > { %1104 = vmatprep.subr.bf16.mxu1 %v1295_v2  ;;  %v368_v11 = vpop.permute.xlu1 %367 }
  0x8f   : > { %v364_v7 = vpop.permute.xlu0 %363 }
  0x90   : > { %1105 = vmatpush3.bf16.msra.mxu1 %v364_v7  ;;  %v1219_v7 = vld [vmem:[%s1542_s4] sm:$0xff]  }
  0x91   : > { %1110 = vmatprep.subr.bf16.mxu1 %v1295_v2 }
  0x93   : > { %1107 = vmatmul.mubr.msk.bf16.vlgmr.msra.gmra.mrb[0].mxu1 %vm370_vm1, %v339_v8  ;;  %v1220_v8 = vld [vmem:[%s1542_s4 + $0x8] sm:$0xff]  }
  0x94   : > { %1111 = vmatpush3.bf16.msra.mxu1 %v1217_v0  ;;  %1114 = vmatprep.mubr.msk.bf16.mxu1 %vm1296_vm0, %v1295_v2 }
  0x95   : > { %1112 = vmatprep.subr.bf16.mxu1 %v1295_v2 }
  0x98   : > { %1113 = vmatpush3.bf16.msra.mxu1 %v1218_v1 }
  0x99   : > { %1124 = vmatprep.subr.bf16.mxu1 %v1295_v2 }
  0x9b   : > { %1115 = vmatmul.mubr.msk.bf16.vlgmr.msra.gmra.mrb[4].mxu1 %vm370_vm1, %v340_v10 }
  0x9c   : > { %1126 = vmatprep.mubr.msk.bf16.mxu1 %vm1296_vm0, %v1295_v2 }
 0x166   : > { %v408_v12 = vpop.f32.mrb[0].mxu1 }
 0x167   : > { %v1108_v13 = vpop.f32.mrb[1].mxu1  ;;  %v409_v15 = vadd.f32 %v408_v12, %v368_v11 }
 0x168   : > { %v411_v14 = vpop.f32.mrb[2].mxu1 }
 0x169   : > { %v412_v16 = vadd.f32 %v411_v14, %v368_v11  ;;  %v1109_v17 = vpop.f32.mrb[3].mxu1 }
 0x16a   : > { %v1466_v17 = vshrl.u32 %v461_v29, 7 }
 0x16b   : > { %v467_v18 = vpack.c.bf16 %v412_v16, %v409_v15 }
 0x16d   : > { %582 = vrot.lane.b32.xlu1 %v467_v18, %s1297_s13  ;;  %v473_v19 = vsel %vm468_vm2, %v467_v18, 0 }
 0x16e   : > { %v455_v20 = vpop.f32.mrb[4].mxu1  ;;  %1119 = vmatpush3.bf16.xpose.msra.mxu0 %v473_v19  ;;  %v1472_v19 = vld [vmem:[%s1546_s8] sm:$0x3f] }
 0x16f   : > { %v456_v21 = vadd.f32 %v1053_v3, %v455_v20  ;;  %v1116_v22 = vpop.f32.mrb[5].mxu1  ;;  %1130 = vmatprep.subr.bf16.mxu0 %v1295_v2 }
 0x170   : > { %v458_v23 = vpop.f32.mrb[6].mxu1 }
 0x171   : > { %v466_v24 = vpack.c.bf16 %v456_v21, %v456_v21  ;;  %v1117_v25 = vpop.f32.mrb[7].mxu1 }
 0x173   : > { %580 = vrot.lane.b32.xlu0 %v466_v24, %s1297_s13 }
 0x175   : > { %1121 = vmatmul.mubr.msk.bf16.vlgmr.msra.gmra.mrb[0].mxu0 %vm468_vm2, %v466_v24 }
 0x176   : > { %1132 = vmatprep.mubr.msk.bf16.mxu0 %vm1296_vm0, %v1295_v2 }
 0x1df   : > { %v583_v26 = vpop.permute.xlu1 %582 }
 0x1e0   : > { %v588_v27 = vsel %vm468_vm2, %v583_v26, 0 }
 0x1e1   : > { %1131 = vmatpush3.bf16.xpose.msra.mxu0 %v588_v27 }
 0x1e2   : > { %1142 = vmatprep.subr.bf16.mxu0 %v1295_v2 }
 0x1e5   : > { %v581_v28 = vpop.permute.xlu0 %580 }
 0x1e8   : > { %1133 = vmatmul.mubr.msk.bf16.vlgmr.msra.gmra.mrb[4].mxu0 %vm468_vm2, %v581_v28 }
 0x1e9   : > { %1146 = vmatprep.mubr.msk.bf16.mxu0 %vm1296_vm0, %v1295_v2  ;;  %1143 = vmatpush3.bf16.msra.mxu0 %v1219_v7 }
 0x1ea   : > { %1144 = vmatprep.subr.bf16.mxu0 %v1295_v2 }
 0x1ed   : > { %1145 = vmatpush3.bf16.msra.mxu0 %v1220_v8 }
 0x1ee   : > { %1158 = vmatprep.subr.bf16.mxu0 %v1295_v2 }
 0x248   : > { %v509_v32 = vpop.f32.mrb[0].mxu0 }
 0x249   : > { %v515_v33 = vmul.f32 0.25, %v509_v32  ;;  %v1122_v34 = vpop.f32.mrb[1].mxu0 }
 0x24a   : > { %v512_v35 = vpop.f32.mrb[2].mxu0  ;;  %v1223_v34 = vld [vmem:[%s1545_s7] sm:$0xff]  }
 0x24b   : > { %v1123_v36 = vpop.f32.mrb[3].mxu0  ;;  %v518_v37 = vsel %vm465_vm3, %v515_v33, -1000000.0  ;;  %v1221_v33 = vld [vmem:[%s1543_s5] sm:$0xff]   ;;  %v1224_v35 = vld [vmem:[%s1545_s7 + $0x8] sm:$0xff]  }
 0x24c   : > { %v519_v38 = vsel %vm468_vm2, %v518_v37, -inf }
 0x24d   : > { %520 = vmax.xlane.f32.xlu1 %v519_v38 }
 0x2bb   : > { %v624_v39 = vpop.f32.mrb[4].mxu0 }
 0x2bc   : > { %v630_v40 = vmul.f32 0.25, %v624_v39  ;;  %v1134_v41 = vpop.f32.mrb[5].mxu0  ;;  %v779_v39 = vsub.s32 1, %v1466_v17 }
 0x2bd   : > { %v627_v42 = vpop.f32.mrb[6].mxu0 }
 0x2be   : > { %v1135_v43 = vpop.f32.mrb[7].mxu0  ;;  %v631_v44 = vsel %vm465_vm3, %v630_v40, -1000000.0  ;;  %v784_v40 = vsub.s32 2, %v1466_v17  ;;  %v780_v41 = vrot.slane %v1472_v19, %v779_v39 }
 0x2bf   : > { %v632_v45 = vsel %vm468_vm2, %v631_v44, -inf }
 0x2c0   : > { %633 = vmax.xlane.f32.xlu0 %v632_v45 }
 0x2da   : > { %v521_v46 = vpop.xlane.xlu1 %520 }
 0x2db   : > { %v522_v47 = vsub.f32 %v518_v37, %v521_v46 }
 0x2dd   : > { %v523_v48 = vmul.f32 1.442695, %v522_v47 }
 0x2df   : > { %1227 = vpow2.f32 %v523_v48  ;;  %v1225_v48 = vld [vmem:[%s1545_s7 + $0x10] sm:$0xff]  }
 0x2e9   : > { %v1228_v49 = vpop.eup %1227 }
 0x2ea   : > { %v525_v50 = vsel %vm468_vm2, %v1228_v49, 0.0 }
 0x2eb   : > { %526 = vadd.xlane.f32.xlu0 %v525_v50  ;;  %v1065_v50 = vld [vmem:[%s1544_s6] ss:$0 sm:$0xff] }
 0x301   : > { %532 = vrot.lane.b32.xlu0 %v467_v18, %s1294_s22 }
 0x34d   : > { %v634_v51 = vpop.xlane.xlu0 %633 }
 0x34e   : > { %v635_v52 = vsub.f32 %v631_v44, %v634_v51  ;;  %v785_v44 = vrot.slane %v1472_v19, %v784_v40 }
 0x350   : > { %v636_v53 = vmul.f32 1.442695, %v635_v52 }
 0x352   : > { %1229 = vpow2.f32 %v636_v53 }
 0x35c   : > { %v1230_v54 = vpop.eup %1229 }
 0x35d   : > { %v638_v55 = vsel %vm468_vm2, %v1230_v54, 0.0 }
 0x35e   : > { %639 = vadd.xlane.f32.xlu1 %v638_v55 }
 0x36f   : > { %644 = vrot.lane.b32.xlu1 %v467_v18, %s1298_s15  ;;  %v705_v18 = vsub.s32 0, %v1466_v17 }
 0x371   : > { %v706_v20 = vrot.slane %v1472_v19, %v705_v18 }
 0x378   : > { %v527_v56 = vpop.xlane.xlu0 %526 }
 0x379   : > { %1231 = vrcp.f32 %v527_v56 }
 0x37c   : > { %v533_v57 = vpop.permute.xlu0 %532 }
 0x37d   : > { %1125 = vmatpush3.bf16.msra.mxu1 %v533_v57 }
 0x37e   : > { %1136 = vmatprep.subr.bf16.mxu1 %v1295_v2 }
 0x383   : > { %v1232_v58 = vpop.eup %1231 }
 0x384   : > { %v529_v59 = vmul.f32 %v1232_v58, %v1228_v49  ;;  %v1226_v49 = vld [vmem:[%s1545_s7 + $0x18] sm:$0xff]  }
 0x386   : > { %v530_v60 = vpack.c.bf16 %v529_v59, %v529_v59 }
 0x388   : > { %1127 = vmatmul.mubr.msk.bf16.vlgmr.msra.gmra.mrb[8].mxu1 %vm468_vm2, %v530_v60 }
 0x389   : > { %1138 = vmatprep.mubr.msk.bf16.mxu1 %vm1296_vm0, %v1295_v2 }
 0x3eb   : > { %v640_v61 = vpop.xlane.xlu1 %639 }
 0x3ec   : > { %1233 = vrcp.f32 %v640_v61 }
 0x3ef   : > { %v645_v62 = vpop.permute.xlu1 %644 }
 0x3f0   : > { %1137 = vmatpush3.bf16.msra.mxu1 %v645_v62 }
 0x3f1   : > { %1150 = vmatprep.subr.bf16.mxu1 %v1295_v2 }
 0x3f6   : > { %v1234_v63 = vpop.eup %1233 }
 0x3f7   : > { %v642_v0 = vmul.f32 %v1234_v63, %v1230_v54 }
 0x3f9   : > { %v643_v1 = vpack.c.bf16 %v642_v0, %v642_v0 }
 0x3fb   : > { %1139 = vmatmul.mubr.msk.bf16.vlgmr.msra.gmra.mrb[12].mxu1 %vm468_vm2, %v643_v1 }
 0x3fc   : > { %1154 = vmatprep.mubr.msk.bf16.mxu1 %vm1296_vm0, %v1295_v2  ;;  %1151 = vmatpush3.bf16.msra.mxu1 %v1221_v33 }
 0x3fd   : > { %1152 = vmatprep.subr.bf16.mxu1 %v1295_v2 }
 0x45b   : > { %v572_v3 = vpop.f32.mrb[8].mxu1 }
 0x45c   : > { %578 = vst.msk [vmem:[#allocation2] sm:$0xff] %vm468_vm2, %v572_v3  ;;  %v1128_v4 = vpop.f32.mrb[9].mxu1 }
 0x45d   : > { %v575_v5 = vpop.f32.mrb[10].mxu1 }
 0x45e   : > { %v1129_v6 = vpop.f32.mrb[11].mxu1 }
 0x4ce   : > { %v684_v10 = vpop.f32.mrb[12].mxu1 }
 0x4cf   : > { %691 = vrot.lane.b32.xlu1 %v684_v10, %s1299_s25  ;;  %v1140_v11 = vpop.f32.mrb[13].mxu1 }
 0x4d0   : > { %v687_v12 = vpop.f32.mrb[14].mxu1 }
 0x4d1   : > { %v1141_v13 = vpop.f32.mrb[15].mxu1  ;;  %v952_v12 = vsub.s32 4, %v1466_v17 }
 0x4d2   : > { %v957_v13 = vsub.s32 5, %v1466_v17 }
 0x541   : > { %v692_v14 = vpop.permute.xlu1 %691 }
 0x542   : > { %695 = vst.msk [vmem:[#allocation2] sm:$0xff] %vm694_vm4, %v692_v14  ;;  %v953_v14 = vrot.slane %v1472_v19, %v952_v12 }
 0x549   : > { %v697_v15 = vld [vmem:[#allocation2] sm:$0xff] }
 0x54a   : > { %v698_v16 = vpack.c.bf16 %v697_v15, %v697_v15 }
 0x54c   : > { %1147 = vmatmul.mubr.msk.bf16.vlgmr.msra.gmra.mrb[8].mxu0 %vm370_vm1, %v698_v16  ;;  %v958_v16 = vrot.slane %v1472_v19, %v957_v13 }
 0x54d   : > { %1166 = vmatprep.mubr.msk.bf16.mxu0 %vm1296_vm0, %v1295_v2  ;;  %1159 = vmatpush3.bf16.msra.mxu0 %v1223_v34 }
 0x54e   : > { %1160 = vmatprep.subr.bf16.mxu0 %v1295_v2 }
 0x551   : > { %1161 = vmatpush3.bf16.msra.mxu0 %v1224_v35 }
 0x552   : > { %1162 = vmatprep.subr.bf16.mxu0 %v1295_v2 }
 0x555   : > { %1163 = vmatpush3.bf16.msra.mxu0 %v1225_v48 }
 0x556   : > { %1164 = vmatprep.subr.bf16.mxu0 %v1295_v2  ;;  %v866_v2 = vsub.s32 3, %v1466_v17 }
 0x558   : > { %v867_v58 = vrot.slane %v1472_v19, %v866_v2 }
 0x559   : > { %1165 = vmatpush3.bf16.msra.mxu0 %v1226_v49 }
 0x61f   : > { %v756_v21 = vpop.f32.mrb[8].mxu0 }
 0x620   : > { %v757_v22 = vadd.f32 %v756_v21, %v706_v20  ;;  %v1148_v23 = vpop.f32.mrb[9].mxu0 }
 0x621   : > { %v759_v24 = vpop.f32.mrb[10].mxu0 }
 0x622   : > { %v1149_v25 = vpop.f32.mrb[11].mxu0  ;;  %v762_v26 = vadd.f32 %v757_v22, %v1419_v9  ;;  %v1222_v9 = vld [vmem:[%s1543_s5 + $0x8] sm:$0xff]  }
 0x623   : > { %1153 = vmatpush3.bf16.msra.mxu1 %v1222_v9 }
 0x624   : > { %v763_v27 = vsel %vm370_vm1, %v762_v26, 0.0 }
 0x625   : > { %764 = vadd.xlane.f32.xlu0 %v763_v27 }
 0x6b2   : > { %v765_v28 = vpop.xlane.xlu0 %764 }
 0x6b3   : > { %v767_v29 = vmul.f32 0.03125, %v765_v28 }
 0x6b5   : > { %v768_v30 = vsub.f32 %v762_v26, %v767_v29 }
 0x6b7   : > { %v769_v31 = vmul.f32 %v768_v30, %v768_v30 }
 0x6b9   : > { %v770_v32 = vsel %vm370_vm1, %v769_v31, 0.0 }
 0x6ba   : > { %771 = vadd.xlane.f32.xlu1 %v770_v32 }
 0x747   : > { %v772_v36 = vpop.xlane.xlu1 %771 }
 0x748   : > { %v773_v37 = vmul.f32 0.03125, %v772_v36 }
 0x74a   : > { %v774_v38 = vadd.f32 1e-05, %v773_v37 }
 0x74c   : > { %1235 = vrsqrt.f32 %v774_v38 }
 0x756   : > { %v1236_v42 = vpop.eup %1235 }
 0x757   : > { %v776_v43 = vmul.f32 %v1236_v42, %v768_v30 }
 0x759   : > { %v781_v45 = vmul.f32 %v780_v41, %v776_v43 }
 0x75b   : > { %v786_v46 = vadd.f32 %v785_v44, %v781_v45 }
 0x75d   : > { %v787_v47 = vpack.c.bf16 %v786_v46, %v786_v46 }
 0x75f   : > { %1155 = vmatmul.mubr.msk.bf16.vlgmr.msra.gmra.mrb[16].mxu1 %vm370_vm1, %v787_v47 }
 0x832   : > { %v848_v51 = vpop.f32.mrb[16].mxu1 }
 0x833   : > { %v849_v52 = vadd.f32 %v1065_v50, %v848_v51  ;;  %v1156_v53 = vpop.f32.mrb[17].mxu1 }
 0x834   : > { %v851_v54 = vpop.f32.mrb[18].mxu1 }
 0x835   : > { %v854_v55 = vmax.f32 %v849_v52, 0.0  ;;  %v1157_v56 = vpop.f32.mrb[19].mxu1 }
 0x837   : > { %v855_v57 = vpack.c.bf16 %v854_v55, %v854_v55 }
 0x839   : > { %1167 = vmatmul.mubr.msk.bf16.vlgmr.msra.gmra.mrb[12].mxu0 %vm892_vm5, %v855_v57 }
 0x90c   : > { %v930_v59 = vpop.f32.mrb[12].mxu0 }
 0x90d   : > { %v931_v60 = vadd.f32 %v930_v59, %v867_v58  ;;  %v1168_v61 = vpop.f32.mrb[13].mxu0 }
 0x90e   : > { %v933_v62 = vpop.f32.mrb[14].mxu0 }
 0x90f   : > { %v1169_v63 = vpop.f32.mrb[15].mxu0  ;;  %v936_v0 = vadd.f32 %v931_v60, %v786_v46 }
 0x911   : > { %v937_v1 = vsel %vm370_vm1, %v936_v0, 0.0 }
 0x912   : > { %938 = vadd.xlane.f32.xlu0 %v937_v1 }
 0x99f   : > { %v939_v3 = vpop.xlane.xlu0 %938 }
 0x9a0   : > { %v940_v4 = vmul.f32 0.03125, %v939_v3 }
 0x9a2   : > { %v941_v5 = vsub.f32 %v936_v0, %v940_v4 }
 0x9a4   : > { %v942_v6 = vmul.f32 %v941_v5, %v941_v5 }
 0x9a6   : > { %v943_v7 = vsel %vm370_vm1, %v942_v6, 0.0 }
 0x9a7   : > { %944 = vadd.xlane.f32.xlu0 %v943_v7 }
 0xa34   : > { %v945_v8 = vpop.xlane.xlu0 %944 }
 0xa35   : > { %v946_v10 = vmul.f32 0.03125, %v945_v8 }
 0xa37   : > { %v947_v11 = vadd.f32 1e-05, %v946_v10 }
 0xa39   : > { %1237 = vrsqrt.f32 %v947_v11 }
 0xa43   : > { %v1238_v15 = vpop.eup %1237 }
 0xa44   : > { %v949_v18 = vmul.f32 %v1238_v15, %v941_v5 }
 0xa46   : > { %v954_v20 = vmul.f32 %v953_v14, %v949_v18 }
 0xa48   : > { %v959_v21 = vadd.f32 %v958_v16, %v954_v20 }
 0xa4a   : > { %960 = vst.msk [vmem:[%s332_s12] sm:$0xff] %vm370_vm1, %v959_v21 }
 0xa4b PF: > { %s25_s17 = sadd.s32 1, %s1291_s17   ;;  %s1548_s14 = smov %s1283_s16 }
 0xa4c   : > { %p22_p12 = scmp.ge.s32.totalorder %s25_s17, 6   ;;  %s1549_s15 = smov %s1287_s0 }
 0xa4d   : > { %s1550_s16 = smov %s1553_s18  ;;  %s1551_s0 = smov %s1557_s19 }
 0xa4e   :  { %24 = sbr.rel (!%p22_p12) target bundleno = 18 (0x12), region = 83 }

// kernel: bert_encoder_forward.3
= control target key start
LH: loop header
LB: loop body
LE: loop exit
PB: predicated region body
PF: predicated region fallthrough
CT: control target
= control target key end

     0   :  { %s1700_s0 = inlined_call_operand.vmem [shape: s32[2], index: 0, kind: input, shape index: {}]   ;;  %s1701_s1 = inlined_call_operand.vmem [shape: f32[2,16,32], index: 1, kind: input, shape index: {}]   ;;  %s1702_s2 = inlined_call_operand.vmem [shape: bf16[32,96], index: 2, kind: input, shape index: {}]   ;;  %s1703_s3 = inlined_call_operand.vmem [shape: f32[1,96], index: 3, kind: input, shape index: {}]   ;;  %s1704_s4 = inlined_call_operand.vmem [shape: bf16[32,32], index: 4, kind: input, shape index: {}]   ;;  %s1705_s5 = inlined_call_operand.vmem [shape: bf16[32,64], index: 5, kind: input, shape index: {}]   ;;  %s1706_s6 = inlined_call_operand.vmem [shape: f32[1,64], index: 6, kind: input, shape index: {}]   ;;  %s1707_s7 = inlined_call_operand.vmem [shape: bf16[64,32], index: 7, kind: input, shape index: {}]   ;;  %s1708_s8 = inlined_call_operand.vmem [shape: f32[6,32], index: 8, kind: input, shape index: {}]   ;;  %s1709_s9 = inlined_call_operand.hbm [shape: f32[2,16,32], index: 9, kind: output, shape index: {}]  }
   0x1   :  { %1710 = sst [smem:[#allocation9_spill]] %s1701_s1  ;;  %s14_s11 = sshll.u32 %s1700_s0, 4  ;;  %s15_s11 = int_to_ptr.vmem [resolvable:$true] %s14_s11 }
   0x2   :  { %s1272_s12 = scalar_lea.vmem %s15_s11, 16  ;;  %p1277_p1 = scmp.lt.s32.totalorder %s15_s11, %s15_s11 }
   0x3   :  { %p1273_p0 = scmp.ne.s32.totalorder %s15_s11, %s1272_s12  ;;  %p1278_p2 = scmp.lt.s32.totalorder %s1272_s12, %s1272_s12 }
   0x5   :  { %p1279_p3 = por %p1278_p2, %p1277_p1 }
   0x7   :  { %p1280_p4 = pnand %p1279_p3, %p1273_p0 }
   0x9   :  { %1283 = shalt.err (!%p1280_p4)  }
   0xa   :  { %s1382_s13 = smov [#allocation4]  }
   0xb   :  { %17 = dma.vmem_to_smem %s15_s11, 16, %s1382_s13, [#allocation3] }
   0xc   :  { %1344 = dma.done.wait [#allocation3], 16 }
   0xd   :  { %1345 = vsyncadd [#allocation3], 4294967280 }
   0xe   :  { %19 = sfence }
   0xf   :  { %20 = vsyncpa [#allocation6], 0 }
  0x10   :  { %22 = vsyncpa [#allocation6 + $0x1], 0  ;;  %s1443_s14 = smov 0   ;;  %s1445_s15 = smov 0  }
  0x11   :  { %s1447_s0 = smov 0   ;;  %s1449_s16 = smov 0  }
  0x12   :  { %s1451_s17 = smov 0   ;;  %s1453_s18 = smov 0  }
  0x13   :  { %s1455_s19 = smov 0   ;;  %s1457_s20 = smov 0  }
  0x14 LB: > { %s1043_s21 = sadd.s32 4294967295, %s1380_s20   ;;  %s1044_s22 = sadd.s32 4294967294, %s1380_s20   ;;  %s1380_s20 = sphi %s1457_s20, %s28_s20   ;;  %s1376_s19 = sphi %s1455_s19, %s1720_s19   ;;  %s1372_s18 = sphi %s1453_s18, %s1719_s18   ;;  %s1368_s17 = sphi %s1451_s17, %s1718_s17   ;;  %s1364_s16 = sphi %s1449_s16, %s1717_s16   ;;  %s1360_s0 = sphi %s1447_s0, %s1716_s0   ;;  %s1356_s15 = sphi %s1445_s15, %s1715_s15   ;;  %s1352_s14 = sphi %s1443_s14, %s1714_s14  }
  0x15   : > { %s37_s23 = sadd.s32 1, %s1372_s18  ;;  %s40_s24 = sadd.s32 1, %s1376_s19 }
  0x16   : > { %p38_p5 = scmp.ge.s32.totalorder %s37_s23, 2  ;;  %p232_p6 = scmp.ne.s32.totalorder %s1360_s0, %s1356_s15 }
  0x17   : > { %p233_p7 = scmp.eq.s32.totalorder %s1043_s21, 3  ;;  %p238_p10 = scmp.ne.s32.totalorder %s1356_s15, %s1352_s14 }
  0x18   : > { %s1722_s23 = smov (%p38_p5, %s37_s23), 0  ;;  %s1724_s24 = smov (!%p38_p5, %s40_s24), %s1376_s19 }
  0x19   : > { %s218_s25 = ssub.s32 %s1372_s18, %s1722_s23  ;;  %p1494_p8 = por %p233_p7, %p232_p6 }
  0x1a   : > { %p42_p9 = scmp.ge.s32.totalorder %s1724_s24, 2  ;;  %p239_p11 = scmp.eq.s32.totalorder %s1044_s22, 3 }
  0x1b   : > { %p1047_p12 = scmp.ge.s32.totalorder %s1380_s20, 1  ;;  %p286_p0 = scmp.lt.s32.totalorder %s1380_s20, 5 }
  0x1c   : > { %s1726_s24 = smov (%p42_p9, %s1724_s24), 0  ;;  %p1503_p13 = por %p239_p11, %p238_p10 }
  0x1d   : > { %s217_s28 = ssub.s32 %s1376_s19, %s1726_s24  ;;  %s222_s29 = sadd.s32 1, %s1360_s0 }
  0x1e   : > { %s219_s30 = sor.u32 %s218_s25, %s217_s28  ;;  %p287_p1 = pnand %p1047_p12, %p286_p0 }
  0x1f   : > { %p220_p2 = scmp.eq.s32.totalorder %s219_s30, 0  ;;  %v1250_v0 = vld [vmem:[%s1702_s2] sm:$0xff] (!%p287_p1)   ;;  %s1383_s13 = smov (!%p287_p1), 96   ;;  %v1251_v1 = vld [vmem:[%s1702_s2 + $0x8] sm:$0xff] (!%p287_p1)   ;;  %v1384_v2 = vmov (!%p287_p1), 0.0   ;;  %vm1385_vm0 = vmmov (!%p287_p1), 0   ;;  %v453_v29 = vlaneseq (!%p287_p1) }
  0x20   : > { %290 = sbr.rel (%p287_p1) target bundleno = 2655 (0xa5f), region = 52  ;;  %353 = vrot.lane.b32.xlu0 (!%p287_p1), %v1250_v0, %s1383_s13  ;;  %1104 = vmatprep.subr.bf16.mxu1 (!%p287_p1), %v1384_v2  ;;  %v1052_v3 = vld [vmem:[%s1703_s3] ss:$0 sm:$0xff] (!%p287_p1)  ;;  %p320_p3 = scmp.lt.s32.totalorder (!%p287_p1), %s1368_s17, 1  ;;  %vm362_vm1 = vcmask (!%p287_p1), 261120   ;;  %vm460_vm2 = vcmask (!%p287_p1), 130048  }
  0x21   : > { %s1512_s10 = scalar_select %p220_p2, %s1360_s0, %s222_s29  }
  0x22   : > { %1108 = vmatprep.mubr.msk.bf16.mxu1 (!%p287_p1), %vm1385_vm0, %v1384_v2  ;;  %1120 = vmatprep.subr.bf16.mxu0 (!%p287_p1), %v1384_v2  ;;  %s1713_s1 = sld [smem:[#allocation9_spill]] (!%p287_p1)  ;;  %s1051_s22 = sshll.u32 (!%p287_p1), %s1364_s16, 3  ;;  %v454_v30 = vand.u32 (!%p287_p1), 127, %v453_v29  ;;  %vm686_vm4 = vcmask (!%p287_p1), 261248   ;;  %vm884_vm5 = vcmask (!%p287_p1), 523264  }
  0x23   : > { %1122 = vmatprep.mubr.msk.bf16.mxu0 (!%p287_p1), %vm1385_vm0, %v1384_v2  ;;  %359 = vrot.lane.b32.xlu1 (!%p287_p1), %v1052_v3, %s1383_s13  ;;  %s1386_s28 = smov (!%p287_p1), 112  }
  0x24   : > { %355 = vrot.lane.b32.xlu0 (!%p287_p1), %v1251_v1, %s1383_s13 }
  0x27   : > { %s321_s29 = scalar_select %p320_p3, %s1368_s17, 1 }
  0x29   : > { %s1078_s30 = sshll.u32 %s321_s29, 4  ;;  %s455_s29 = sld [smem:[#allocation4 + %s1368_s17]] }
  0x2a   : > { %s324_s21 = scalar_lea.vmem %s1713_s1, %s1078_s30  ;;  %s1387_s30 = smov 80  }
  0x2b   : > { %v326_v5 = vld [vmem:[%s324_s21] sm:$0xff]  ;;  %v327_v6 = vld [vmem:[%s324_s21 + $0x8] sm:$0xff]  ;;  %s329_s25 = scalar_lea.vmem %s324_s21, %s1051_s22  ;;  %s1388_s22 = smov 16  }
  0x2c   : > { %v331_v8 = vpack.c.bf16 %v327_v6, %v326_v5  ;;  %v1543_v9 = vld [vmem:[%s329_s25] sm:$0xff]  ;;  %s317_s21 = sand.u32 1, %s1356_s15   ;;  %s1074_s25 = sshll.u32 %s1368_s17, 1 }
  0x2d   : > { %v332_v10 = vpack.c.bf16 %v1543_v9, %v1543_v9 }
  0x2f   : > { %v456_v31 = vstv %s455_s29 }
  0x30   : > { %vm457_vm3 = vcmp.lt.s32.totalorder %v454_v30, %v456_v31 }
  0x92   : > { %v354_v4 = vpop.permute.xlu0 %353 }
  0x93   : > { %1105 = vmatpush3.bf16.msra.mxu1 %v354_v4 }
  0x94   : > { %1106 = vmatprep.subr.bf16.mxu1 %v1384_v2 }
  0x95   : > { %v360_v11 = vpop.permute.xlu1 %359 }
  0x96   : > { %v356_v7 = vpop.permute.xlu0 %355 }
  0x97   : > { %1107 = vmatpush3.bf16.msra.mxu1 %v356_v7  ;;  %v1252_v7 = vld [vmem:[%s1704_s4] sm:$0xff]  }
  0x98   : > { %1112 = vmatprep.subr.bf16.mxu1 %v1384_v2 }
  0x9a   : > { %1109 = vmatmul.mubr.msk.bf16.vlgmr.msra.gmra.mrb[0].mxu1 %vm362_vm1, %v331_v8  ;;  %v1253_v8 = vld [vmem:[%s1704_s4 + $0x8] sm:$0xff]  }
  0x9b   : > { %1113 = vmatpush3.bf16.msra.mxu1 %v1250_v0  ;;  %1116 = vmatprep.mubr.msk.bf16.mxu1 %vm1385_vm0, %v1384_v2 }
  0x9c   : > { %1114 = vmatprep.subr.bf16.mxu1 %v1384_v2 }
  0x9f   : > { %1115 = vmatpush3.bf16.msra.mxu1 %v1251_v1 }
  0xa0   : > { %1126 = vmatprep.subr.bf16.mxu1 %v1384_v2 }
  0xa2   : > { %1117 = vmatmul.mubr.msk.bf16.vlgmr.msra.gmra.mrb[4].mxu1 %vm362_vm1, %v332_v10 }
  0xa3   : > { %1128 = vmatprep.mubr.msk.bf16.mxu1 %vm1385_vm0, %v1384_v2 }
 0x16d   : > { %v400_v12 = vpop.f32.mrb[0].mxu1 }
 0x16e   : > { %v1110_v13 = vpop.f32.mrb[1].mxu1  ;;  %v401_v15 = vadd.f32 %v400_v12, %v360_v11 }
 0x16f   : > { %v403_v14 = vpop.f32.mrb[2].mxu1 }
 0x170   : > { %v404_v16 = vadd.f32 %v403_v14, %v360_v11  ;;  %v1111_v17 = vpop.f32.mrb[3].mxu1 }
 0x171   : > { %v1590_v17 = vshrl.u32 %v453_v29, 7 }
 0x172   : > { %v459_v18 = vpack.c.bf16 %v404_v16, %v401_v15 }
 0x174   : > { %574 = vrot.lane.b32.xlu1 %v459_v18, %s1386_s28  ;;  %v465_v19 = vsel %vm460_vm2, %v459_v18, 0 }
 0x175   : > { %v447_v20 = vpop.f32.mrb[4].mxu1  ;;  %1121 = vmatpush3.bf16.xpose.msra.mxu0 %v465_v19  ;;  %v1596_v19 = vld [vmem:[%s1708_s8] sm:$0x3f] }
 0x176   : > { %v448_v21 = vadd.f32 %v1052_v3, %v447_v20  ;;  %v1118_v22 = vpop.f32.mrb[5].mxu1  ;;  %1132 = vmatprep.subr.bf16.mxu0 %v1384_v2 }
 0x177   : > { %v450_v23 = vpop.f32.mrb[6].mxu1 }
 0x178   : > { %v458_v24 = vpack.c.bf16 %v448_v21, %v448_v21  ;;  %v1119_v25 = vpop.f32.mrb[7].mxu1 }
 0x17a   : > { %572 = vrot.lane.b32.xlu0 %v458_v24, %s1386_s28  ;;  %s965_s28 = sadd.s32 %s1364_s16, %s1074_s25  ;;  %s954_s16 = scalar_lea.sflag [#allocation6], %s317_s21 }
 0x17b   : > { %s1075_s29 = sshll.u32 %s965_s28, 7 }
 0x17c   : > { %1123 = vmatmul.mubr.msk.bf16.vlgmr.msra.gmra.mrb[0].mxu0 %vm460_vm2, %v458_v24  ;;  %s1646_s1 = scalar_lea.hbm %s1709_s9, %s1075_s29 }
 0x17d   : > { %1134 = vmatprep.mubr.msk.bf16.mxu0 %vm1385_vm0, %v1384_v2 }
 0x1e6   : > { %v575_v26 = vpop.permute.xlu1 %574 }
 0x1e7   : > { %v580_v27 = vsel %vm460_vm2, %v575_v26, 0 }
 0x1e8   : > { %1133 = vmatpush3.bf16.xpose.msra.mxu0 %v580_v27 }
 0x1e9   : > { %1144 = vmatprep.subr.bf16.mxu0 %v1384_v2 }
 0x1ec   : > { %v573_v28 = vpop.permute.xlu0 %572 }
 0x1ef   : > { %1135 = vmatmul.mubr.msk.bf16.vlgmr.msra.gmra.mrb[4].mxu0 %vm460_vm2, %v573_v28 }
 0x1f0   : > { %1148 = vmatprep.mubr.msk.bf16.mxu0 %vm1385_vm0, %v1384_v2  ;;  %1145 = vmatpush3.bf16.msra.mxu0 %v1252_v7 }
 0x1f1   : > { %1146 = vmatprep.subr.bf16.mxu0 %v1384_v2 }
 0x1f4   : > { %1147 = vmatpush3.bf16.msra.mxu0 %v1253_v8 }
 0x1f5   : > { %1160 = vmatprep.subr.bf16.mxu0 %v1384_v2 }
 0x24f   : > { %v501_v32 = vpop.f32.mrb[0].mxu0 }
 0x250   : > { %v507_v33 = vmul.f32 0.25, %v501_v32  ;;  %v1124_v34 = vpop.f32.mrb[1].mxu0 }
 0x251   : > { %v504_v35 = vpop.f32.mrb[2].mxu0  ;;  %v1256_v34 = vld [vmem:[%s1707_s7] sm:$0xff]  }
 0x252   : > { %v1125_v36 = vpop.f32.mrb[3].mxu0  ;;  %v510_v37 = vsel %vm457_vm3, %v507_v33, -1000000.0  ;;  %v1254_v33 = vld [vmem:[%s1705_s5] sm:$0xff]   ;;  %v1257_v35 = vld [vmem:[%s1707_s7 + $0x8] sm:$0xff]  }
 0x253   : > { %v511_v38 = vsel %vm460_vm2, %v510_v37, -inf }
 0x254   : > { %512 = vmax.xlane.f32.xlu1 %v511_v38 }
 0x2c2   : > { %v616_v39 = vpop.f32.mrb[4].mxu0 }
 0x2c3   : > { %v622_v40 = vmul.f32 0.25, %v616_v39  ;;  %v1136_v41 = vpop.f32.mrb[5].mxu0  ;;  %v771_v39 = vsub.s32 1, %v1590_v17 }
 0x2c4   : > { %v619_v42 = vpop.f32.mrb[6].mxu0 }
 0x2c5   : > { %v1137_v43 = vpop.f32.mrb[7].mxu0  ;;  %v623_v44 = vsel %vm457_vm3, %v622_v40, -1000000.0  ;;  %v776_v40 = vsub.s32 2, %v1590_v17  ;;  %v772_v41 = vrot.slane %v1596_v19, %v771_v39 }
 0x2c6   : > { %v624_v45 = vsel %vm460_vm2, %v623_v44, -inf }
 0x2c7   : > { %625 = vmax.xlane.f32.xlu0 %v624_v45 }
 0x2e1   : > { %v513_v46 = vpop.xlane.xlu1 %512 }
 0x2e2   : > { %v514_v47 = vsub.f32 %v510_v37, %v513_v46 }
 0x2e4   : > { %v515_v48 = vmul.f32 1.442695, %v514_v47 }
 0x2e6   : > { %1260 = vpow2.f32 %v515_v48  ;;  %v1258_v48 = vld [vmem:[%s1707_s7 + $0x10] sm:$0xff]  }
 0x2f0   : > { %v1261_v49 = vpop.eup %1260 }
 0x2f1   : > { %v517_v50 = vsel %vm460_vm2, %v1261_v49, 0.0 }
 0x2f2   : > { %518 = vadd.xlane.f32.xlu0 %v517_v50  ;;  %v1064_v50 = vld [vmem:[%s1706_s6] ss:$0 sm:$0xff] }
 0x308   : > { %524 = vrot.lane.b32.xlu0 %v459_v18, %s1383_s13 }
 0x354   : > { %v626_v51 = vpop.xlane.xlu0 %625 }
 0x355   : > { %v627_v52 = vsub.f32 %v623_v44, %v626_v51  ;;  %v777_v44 = vrot.slane %v1596_v19, %v776_v40 }
 0x357   : > { %v628_v53 = vmul.f32 1.442695, %v627_v52 }
 0x359   : > { %1262 = vpow2.f32 %v628_v53 }
 0x363   : > { %v1263_v54 = vpop.eup %1262 }
 0x364   : > { %v630_v55 = vsel %vm460_vm2, %v1263_v54, 0.0 }
 0x365   : > { %631 = vadd.xlane.f32.xlu1 %v630_v55 }
 0x376   : > { %636 = vrot.lane.b32.xlu1 %v459_v18, %s1387_s30  ;;  %v697_v18 = vsub.s32 0, %v1590_v17 }
 0x378   : > { %v698_v20 = vrot.slane %v1596_v19, %v697_v18 }
 0x37f   : > { %v519_v56 = vpop.xlane.xlu0 %518 }
 0x380   : > { %1264 = vrcp.f32 %v519_v56 }
 0x383   : > { %v525_v57 = vpop.permute.xlu0 %524 }
 0x384   : > { %1127 = vmatpush3.bf16.msra.mxu1 %v525_v57 }
 0x385   : > { %1138 = vmatprep.subr.bf16.mxu1 %v1384_v2 }
 0x38a   : > { %v1265_v58 = vpop.eup %1264 }
 0x38b   : > { %v521_v59 = vmul.f32 %v1265_v58, %v1261_v49  ;;  %v1259_v49 = vld [vmem:[%s1707_s7 + $0x18] sm:$0xff]  }
 0x38d   : > { %v522_v60 = vpack.c.bf16 %v521_v59, %v521_v59 }
 0x38f   : > { %1129 = vmatmul.mubr.msk.bf16.vlgmr.msra.gmra.mrb[8].mxu1 %vm460_vm2, %v522_v60 }
 0x390   : > { %1140 = vmatprep.mubr.msk.bf16.mxu1 %vm1385_vm0, %v1384_v2 }
 0x3f2   : > { %v632_v61 = vpop.xlane.xlu1 %631 }
 0x3f3   : > { %1266 = vrcp.f32 %v632_v61 }
 0x3f6   : > { %v637_v62 = vpop.permute.xlu1 %636 }
 0x3f7   : > { %1139 = vmatpush3.bf16.msra.mxu1 %v637_v62 }
 0x3f8   : > { %1152 = vmatprep.subr.bf16.mxu1 %v1384_v2 }
 0x3fd   : > { %v1267_v63 = vpop.eup %1266 }
 0x3fe   : > { %v634_v0 = vmul.f32 %v1267_v63, %v1263_v54 }
 0x400   : > { %v635_v1 = vpack.c.bf16 %v634_v0, %v634_v0 }
 0x402   : > { %1141 = vmatmul.mubr.msk.bf16.vlgmr.msra.gmra.mrb[12].mxu1 %vm460_vm2, %v635_v1 }
 0x403   : > { %1156 = vmatprep.mubr.msk.bf16.mxu1 %vm1385_vm0, %v1384_v2  ;;  %1153 = vmatpush3.bf16.msra.mxu1 %v1254_v33 }
 0x404   : > { %1154 = vmatprep.subr.bf16.mxu1 %v1384_v2 }
 0x462   : > { %v564_v3 = vpop.f32.mrb[8].mxu1 }
 0x463   : > { %570 = vst.msk [vmem:[#allocation2] sm:$0xff] %vm460_vm2, %v564_v3  ;;  %v1130_v4 = vpop.f32.mrb[9].mxu1 }
 0x464   : > { %v567_v5 = vpop.f32.mrb[10].mxu1 }
 0x465   : > { %v1131_v6 = vpop.f32.mrb[11].mxu1 }
 0x4d5   : > { %v676_v10 = vpop.f32.mrb[12].mxu1 }
 0x4d6   : > { %683 = vrot.lane.b32.xlu1 %v676_v10, %s1388_s22  ;;  %v1142_v11 = vpop.f32.mrb[13].mxu1  ;;  %s1048_s22 = sshll.u32 %s317_s21, 3 }
 0x4d7   : > { %v679_v12 = vpop.f32.mrb[14].mxu1  ;;  %s319_s30 = scalar_lea.vmem [#allocation5], %s1048_s22  ;;  %s1389_s22 = smov [#allocation5]  }
 0x4d8   : > { %v1143_v13 = vpop.f32.mrb[15].mxu1  ;;  %v944_v12 = vsub.s32 4, %v1590_v17  ;;  %s969_s13 = sshll.u32 %s319_s30, 4  ;;  %s1288_s25 = sshll.u32 %s1389_s22, 4  ;;  %s1648_s13 = int_to_ptr.vmem [resolvable:$true] %s969_s13  ;;  %s1289_s25 = int_to_ptr.vmem [resolvable:$false] %s1288_s25 }
 0x4d9   : > { %v949_v13 = vsub.s32 5, %v1590_v17  ;;  %s1284_s17 = scalar_lea.vmem %s1648_s13, 128  ;;  %s1290_s28 = scalar_lea.vmem %s1289_s25, 256 }
 0x4da   : > { %p1285_p4 = scmp.ne.s32.totalorder %s1648_s13, %s1284_s17  ;;  %p1291_p7 = scmp.lt.s32.totalorder %s1648_s13, %s1289_s25 }
 0x4db   : > { %v950_v18 = vrot.slane %v1596_v19, %v949_v13  ;;  %p1292_p9 = scmp.lt.s32.totalorder %s1290_s28, %s1284_s17 }
 0x4dc   : > { %p1286_p5 = pnand %p1285_p4, %p1494_p8 }
 0x4dd   : > { %p1293_p10 = por %p1292_p9, %p1291_p7 }
 0x4de   : > { %p1287_p6 = pneg %p1286_p5 }
 0x4e0   : > { %p1294_p11 = pnand %p1293_p10, %p1287_p6 }
 0x548   : > { %v684_v14 = vpop.permute.xlu1 %683 }
 0x549   : > { %687 = vst.msk [vmem:[#allocation2] sm:$0xff] %vm686_vm4, %v684_v14  ;;  %v945_v14 = vrot.slane %v1596_v19, %v944_v12 }
 0x550   : > { %v689_v15 = vld [vmem:[#allocation2] sm:$0xff] }
 0x551   : > { %v690_v16 = vpack.c.bf16 %v689_v15, %v689_v15 }
 0x553   : > { %1149 = vmatmul.mubr.msk.bf16.vlgmr.msra.gmra.mrb[8].mxu0 %vm362_vm1, %v690_v16 }
 0x554   : > { %1168 = vmatprep.mubr.msk.bf16.mxu0 %vm1385_vm0, %v1384_v2  ;;  %1161 = vmatpush3.bf16.msra.mxu0 %v1256_v34 }
 0x555   : > { %1162 = vmatprep.subr.bf16.mxu0 %v1384_v2 }
 0x558   : > { %1163 = vmatpush3.bf16.msra.mxu0 %v1257_v35 }
 0x559   : > { %1164 = vmatprep.subr.bf16.mxu0 %v1384_v2 }
 0x55c   : > { %1165 = vmatpush3.bf16.msra.mxu0 %v1258_v48 }
 0x55d   : > { %1166 = vmatprep.subr.bf16.mxu0 %v1384_v2  ;;  %v858_v2 = vsub.s32 3, %v1590_v17 }
 0x55f   : > { %v859_v58 = vrot.slane %v1596_v19, %v858_v2 }
 0x560   : > { %1167 = vmatpush3.bf16.msra.mxu0 %v1259_v49 }
 0x626   : > { %v748_v21 = vpop.f32.mrb[8].mxu0 }
 0x627   : > { %v749_v22 = vadd.f32 %v748_v21, %v698_v20  ;;  %v1150_v23 = vpop.f32.mrb[9].mxu0 }
 0x628   : > { %v751_v24 = vpop.f32.mrb[10].mxu0 }
 0x629   : > { %v1151_v25 = vpop.f32.mrb[11].mxu0  ;;  %v754_v26 = vadd.f32 %v749_v22, %v1543_v9  ;;  %v1255_v9 = vld [vmem:[%s1705_s5 + $0x8] sm:$0xff]  }
 0x62a   : > { %1155 = vmatpush3.bf16.msra.mxu1 %v1255_v9 }
 0x62b   : > { %v755_v27 = vsel %vm362_vm1, %v754_v26, 0.0 }
 0x62c   : > { %756 = vadd.xlane.f32.xlu0 %v755_v27 }
 0x6b9   : > { %v757_v28 = vpop.xlane.xlu0 %756 }
 0x6ba   : > { %v759_v29 = vmul.f32 0.03125, %v757_v28 }
 0x6bc   : > { %v760_v30 = vsub.f32 %v754_v26, %v759_v29 }
 0x6be   : > { %v761_v31 = vmul.f32 %v760_v30, %v760_v30 }
 0x6c0   : > { %v762_v32 = vsel %vm362_vm1, %v761_v31, 0.0 }
 0x6c1   : > { %763 = vadd.xlane.f32.xlu1 %v762_v32 }
 0x74e   : > { %v764_v36 = vpop.xlane.xlu1 %763 }
 0x74f   : > { %v765_v37 = vmul.f32 0.03125, %v764_v36 }
 0x751   : > { %v766_v38 = vadd.f32 1e-05, %v765_v37 }
 0x753   : > { %1268 = vrsqrt.f32 %v766_v38 }
 0x75d   : > { %v1269_v42 = vpop.eup %1268 }
 0x75e   : > { %v768_v43 = vmul.f32 %v1269_v42, %v760_v30 }
 0x760   : > { %v773_v45 = vmul.f32 %v772_v41, %v768_v43 }
 0x762   : > { %v778_v46 = vadd.f32 %v777_v44, %v773_v45 }
 0x764   : > { %v779_v47 = vpack.c.bf16 %v778_v46, %v778_v46 }
 0x766   : > { %1157 = vmatmul.mubr.msk.bf16.vlgmr.msra.gmra.mrb[16].mxu1 %vm362_vm1, %v779_v47 }
 0x839   : > { %v840_v51 = vpop.f32.mrb[16].mxu1 }
 0x83a   : > { %v841_v52 = vadd.f32 %v1064_v50, %v840_v51  ;;  %v1158_v53 = vpop.f32.mrb[17].mxu1 }
 0x83b   : > { %v843_v54 = vpop.f32.mrb[18].mxu1 }
 0x83c   : > { %v846_v55 = vmax.f32 %v841_v52, 0.0  ;;  %v1159_v56 = vpop.f32.mrb[19].mxu1 }
 0x83e   : > { %v847_v57 = vpack.c.bf16 %v846_v55, %v846_v55 }
 0x840   : > { %1169 = vmatmul.mubr.msk.bf16.vlgmr.msra.gmra.mrb[12].mxu0 %vm884_vm5, %v847_v57 }
 0x913   : > { %v922_v59 = vpop.f32.mrb[12].mxu0 }
 0x914   : > { %v923_v60 = vadd.f32 %v922_v59, %v859_v58  ;;  %v1170_v61 = vpop.f32.mrb[13].mxu0 }
 0x915   : > { %v925_v62 = vpop.f32.mrb[14].mxu0 }
 0x916   : > { %v1171_v63 = vpop.f32.mrb[15].mxu0  ;;  %v928_v0 = vadd.f32 %v923_v60, %v778_v46 }
 0x918   : > { %v929_v1 = vsel %vm362_vm1, %v928_v0, 0.0 }
 0x919   : > { %930 = vadd.xlane.f32.xlu0 %v929_v1 }
 0x9a6   : > { %v931_v3 = vpop.xlane.xlu0 %930 }
 0x9a7   : > { %v932_v4 = vmul.f32 0.03125, %v931_v3 }
 0x9a9   : > { %v933_v5 = vsub.f32 %v928_v0, %v932_v4 }
 0x9ab   : > { %v934_v6 = vmul.f32 %v933_v5, %v933_v5 }
 0x9ad   : > { %v935_v7 = vsel %vm362_vm1, %v934_v6, 0.0 }
 0x9ae   : > { %936 = vadd.xlane.f32.xlu0 %v935_v7 }
 0xa3b   : > { %v937_v8 = vpop.xlane.xlu0 %936 }
 0xa3c   : > { %v938_v10 = vmul.f32 0.03125, %v937_v8 }
 0xa3e   : > { %v939_v11 = vadd.f32 1e-05, %v938_v10 }
 0xa40   : > { %1270 = vrsqrt.f32 %v939_v11 }
 0xa4a   : > { %v1271_v15 = vpop.eup %1270 }
 0xa4b   : > { %v941_v16 = vmul.f32 %v1271_v15, %v933_v5 }
 0xa4d   : > { %v946_v20 = vmul.f32 %v945_v14, %v941_v16 }
 0xa4f   : > { %v951_v21 = vadd.f32 %v950_v18, %v946_v20 }
 0xa51   : > { %952 = vst.msk [vmem:[%s319_s30] sm:$0xff] %vm362_vm1, %v951_v21 }
 0xa52   : > { %1297 = shalt.err (!%p1294_p11)
}
 0xa53   : > { %s1298_s21 = scalar_lea.hbm %s1646_s1, 128  ;;  %s1302_s11 = scalar_lea.hbm %s1709_s9, 512 }
 0xa54   : > { %p1299_p12 = scmp.ne.s32.totalorder %s1646_s1, %s1298_s21  ;;  %p1303_p2 = scmp.lt.u32.totalorder %s1646_s1, %s1709_s9 }
 0xa55   : > { %p1304_p3 = scmp.lt.u32.totalorder %s1302_s11, %s1298_s21  ;;  %p1306_p5 = scmp.lt.u32.totalorder %s1298_s21, %s1646_s1 }
 0xa56   : > { %p1300_p0 = pnand %p1299_p12, %p1494_p8 }
 0xa57   : > { %p1305_p4 = por %p1304_p3, %p1303_p2 }
 0xa58   : > { %p1301_p1 = pneg %p1300_p0 }
 0xa59   : > { %p1307_p6 = por %p1306_p5, %p1305_p4 }
 0xa5b   : > { %p1308_p7 = pnand %p1307_p6, %p1301_p1 }
 0xa5d   : > { %1311 = shalt.err (!%p1308_p7)
}
 0xa5e   : > { %1172 = dma.vmem_to_hbm [thread:$0]  (%p1494_p8), %s1648_s13, 128, %s1646_s1, %s954_s16  }
 0xa5f PF: > { %p1178_p9 = scmp.ge.s32.totalorder %s1380_s20, 2  ;;  %s981_s17 = sand.u32 1, %s1352_s14  }
 0xa60   : > { %s982_s25 = scalar_lea.sflag [#allocation6], %s981_s17 }
 0xa61   : > { %p1175_p10 = pnand %p1178_p9, %p1503_p13 }
 0xa63   : > { %1347 = dma.done.wait (!%p1175_p10), %s982_s25, 128  }
 0xa64   : > { %1349 = vsyncadd (!%p1175_p10), %s982_s25, 4294967168  ;;  %s28_s20 = sadd.s32 1, %s1380_s20   ;;  %s1714_s14 = smov %s1356_s15 }
 0xa65   : > { %p25_p11 = scmp.ge.s32.totalorder %s28_s20, 6   ;;  %s1715_s15 = smov %s1360_s0 }
 0xa66   : > { %s1716_s0 = smov %s1512_s10  ;;  %s1717_s16 = smov %s1372_s18 }
 0xa67   : > { %s1718_s17 = smov %s1376_s19  ;;  %s1719_s18 = smov %s1722_s23 }
 0xa68   : > { %s1720_s19 = smov %s1726_s24  ;;  %27 = sbr.rel (!%p25_p11) target bundleno = 20 (0x14), region = 88 }
 0xa6f   :  { %987 = vsyncpa [#allocation6], 1 }
 0xa70   :  { %989 = vsyncpa [#allocation6 + $0x1], 1 }

</bundles_post_ra>
